<compile_context>
chip_gen: v7x
topology: tpu7x:2x2x1
jax: 0.10.0
libtpu: 0.0.40
codegen_flags: <defaults>
</compile_context>

<pallas_src>
import functools
import math

import jax
import jax.numpy as jnp
from jax import lax
from jax.experimental import pallas as pl
from jax.experimental.pallas import tpu as pltpu


# ----------------------------------------------------------------------------
# Generation-aware VMEM budget (v5e/v6e: 128 MiB physical, v7x: 64 MiB).
# ----------------------------------------------------------------------------
def _vmem_limit_bytes():
    try:
        cap = int(pltpu.get_tpu_info().vmem_capacity_bytes)
        return min((cap * 3) // 4, 96 << 20)      # ~96 MiB v5e/v6e, ~48 MiB v7x
    except Exception:
        return 48 << 20                           # conservative fallback


_VMEM_LIMIT = _vmem_limit_bytes()
_BLOCK_BUDGET = int(_VMEM_LIMIT * 0.85)           # leave headroom for Mosaic scratch
_BM_TARGET = 512
_BK_TARGET = 1024 if _VMEM_LIMIT >= (80 << 20) else 512


def _cparams(dimension_semantics):
    return pltpu.CompilerParams(dimension_semantics=dimension_semantics,
                                vmem_limit_bytes=_VMEM_LIMIT)


def _block_options(dim, target, align):
    """Divisors of `dim` that are multiples of `align` and <= target, plus the
    full dim (always legal per the (8,128) block rule), descending."""
    opts = [d for d in range(1, dim + 1)
            if dim % d == 0 and d % align == 0 and d <= target]
    if dim <= target or not opts:
        opts.append(dim)
    return sorted(set(opts), reverse=True)


def _fit_mm_blocks(N, K, M, *, n_act, act_bytes, n_w, out_bytes_sum, n_acc,
                   budget, bm_target=_BM_TARGET, bk_target=_BK_TARGET):
    """Pick (bm, bn, bk) for an (N,K)x(K,M) projection kernel.  Preference:
    full output width bn = M first, then the largest bm, then the largest bk
    that keeps the double-buffered footprint under `budget`."""
    bn_opts = _block_options(M, M, 128)
    bm_opts = _block_options(N, bm_target, 8)
    bk_opts = _block_options(K, bk_target, 128)

    def footprint(bm, bn, bk):
        act = 2 * n_act * bm * bk * act_bytes     # double-buffered activations
        wts = 2 * n_w * bk * bn * 2               # double-buffered bf16 weights
        outs = 2 * bm * bn * out_bytes_sum        # double-buffered outputs
        accs = n_acc * bm * bn * 4                # f32 accumulators (scratch)
        mix = 2 * 3 * bk * 4                      # tiny per-channel vectors
        return act + wts + outs + accs + mix

    best, best_fp = None, None
    for bn in bn_opts:
        for bm in bm_opts:
            for bk in bk_opts:
                fp = footprint(bm, bn, bk)
                if fp <= budget:
                    return bm, bn, bk
                if best_fp is None or fp < best_fp:
                    best, best_fp = (bm, bn, bk), fp
    return best                                   # smallest footprint fallback


def _fit_wkv_blocks(B, T, G, L, *, budget, bt_target, sub_target):
    """Pick (bb, gg, bt) for the WKV recurrence.  bb*gg sublanes of
    independent chains per serial timestep (target ~sub_target = 4 vregs),
    preferring to keep >=2 parallel (b, g) tiles for megacore splitting."""
    gg_opts = [d for d in range(1, G + 1)
               if G % d == 0 and (d % 8 == 0 or d == G)]
    bb_opts = [d for d in range(1, B + 1) if B % d == 0]
    best, best_key = None, None
    for bb in bb_opts:
        for gg in gg_opts:
            work = bb * gg
            par = (B // bb) * (G // gg)
            # throughput proxy: per-step ILP (capped) x up-to-2 TensorCores
            key = (min(work, sub_target) * min(par, 2), work, gg)
            if best_key is None or key > best_key:
                best, best_key = (bb, gg), key
    bb, gg = best

    per_step = bb * gg * L * (4 + 4 + 2 + 2)      # k, v f32 + sr, y bf16
    state = 3 * bb * gg * L * 4 + 2 * 2 * gg * L * 4
    bt = 1
    for d in sorted({d for d in range(1, T + 1)
                     if T % d == 0 and d <= bt_target} | {1}, reverse=True):
        if 2 * d * per_step + state <= budget:
            bt = d
            break
    return bb, gg, bt


# ----------------------------------------------------------------------------
# Kernel 1: fused time-mix + K/V/R projections.
#   k = (x*mk + xx*(1-mk)) @ Wk ; v = (...) @ Wv ; sr = sigmoid((...) @ Wr)
# ----------------------------------------------------------------------------
def _tm_proj_kernel(x_ref, xx_ref, mk_ref, mv_ref, mr_ref,
                    wk_ref, wv_ref, wr_ref,
                    k_out, v_out, sr_out,
                    acc_k, acc_v, acc_r):
    @pl.when(pl.program_id(2) == 0)
    def _():
        acc_k[...] = jnp.zeros_like(acc_k)
        acc_v[...] = jnp.zeros_like(acc_v)
        acc_r[...] = jnp.zeros_like(acc_r)

    x = x_ref[...]                        # (bm, bk) f32
    xx = xx_ref[...]                      # time-shifted input tile
    d = x - xx
    # x*m + xx*(1-m) == xx + m*(x - xx): one shared subtract, no (1-m).
    xk = (xx + mk_ref[...] * d).astype(jnp.bfloat16)
    xv = (xx + mv_ref[...] * d).astype(jnp.bfloat16)
    xr = (xx + mr_ref[...] * d).astype(jnp.bfloat16)
    acc_k[...] += jnp.dot(xk, wk_ref[...], preferred_element_type=jnp.float32)
    acc_v[...] += jnp.dot(xv, wv_ref[...], preferred_element_type=jnp.float32)
    acc_r[...] += jnp.dot(xr, wr_ref[...], preferred_element_type=jnp.float32)

    @pl.when(pl.program_id(2) == pl.num_programs(2) - 1)
    def _():
        k_out[...] = acc_k[...]
        v_out[...] = acc_v[...]
        # sigmoid(r): reciprocal runs on the (otherwise idle) EUP slot.
        sr_out[...] = pl.reciprocal(1.0 + jnp.exp(-acc_r[...]),
                                    approx=True).astype(sr_out.dtype)


def pallas_time_mix_proj(x2, xx2, mk, mv, mr, wk, wv, wr, *, block=None):
    N, C = x2.shape
    D = wk.shape[1]
    if block is None:
        bm, bn, bk = _fit_mm_blocks(N, C, D, n_act=2, act_bytes=4, n_w=3,
                                    out_bytes_sum=4 + 4 + 2, n_acc=3,
                                    budget=_BLOCK_BUDGET)
    else:
        bm, bn, bk = block
    grid = (N // bm, D // bn, C // bk)

    x_spec = pl.BlockSpec((bm, bk), lambda i, j, k: (i, k))
    m_spec = pl.BlockSpec((1, bk), lambda i, j, k: (0, k))
    w_spec = pl.BlockSpec((bk, bn), lambda i, j, k: (k, j))
    o_spec = pl.BlockSpec((bm, bn), lambda i, j, k: (i, j))

    kv_sds = jax.ShapeDtypeStruct((N, D), jnp.float32)
    sr_sds = jax.ShapeDtypeStruct((N, D), jnp.bfloat16)
    return pl.pallas_call(
        _tm_proj_kernel,
        out_shape=(kv_sds, kv_sds, sr_sds),
        grid=grid,
        in_specs=[x_spec, x_spec, m_spec, m_spec, m_spec,
                  w_spec, w_spec, w_spec],
        out_specs=(o_spec, o_spec, o_spec),
        scratch_shapes=[pltpu.VMEM((bm, bn), jnp.float32) for _ in range(3)],
        compiler_params=_cparams(("parallel", "parallel", "arbitrary")),
    )(x2, xx2, mk, mv, mr,
      wk.astype(jnp.bfloat16), wv.astype(jnp.bfloat16),
      wr.astype(jnp.bfloat16))


# ----------------------------------------------------------------------------
# Kernel 2: WKV recurrence (exact port of wkv_cuda.cu forward), fused with the
# sigmoid(r) gate.  Channel dim folded to (G, 128); the batch and channel-group
# dims are blocked into the per-step working set (bb, gg, L) so every serial
# timestep has several vregs of independent chains.  State carried in VMEM
# scratch across time-chunk grid steps.
# ----------------------------------------------------------------------------
def _wkv_kernel(k_ref, v_ref, sr_ref, w_ref, u_ref, o_ref,
                aa_sc, bb_sc, pp_sc):
    @pl.when(pl.program_id(2) == 0)
    def _():
        aa_sc[...] = jnp.zeros_like(aa_sc)
        bb_sc[...] = jnp.zeros_like(bb_sc)
        pp_sc[...] = jnp.full_like(pp_sc, -1e38)

    w = w_ref[...]                        # -exp(time_decay), hoisted to wrapper
    u = u_ref[...]                        # time_first               (gg, L)
    nsteps = k_ref.shape[1]               # block: (bb, bt, gg, L)

    def step(t, carry):
        aa, bb, pp = carry                # (bb, gg, L) each
        kt = k_ref[:, t]                  # (bb, gg, L)
        vt = v_ref[:, t]
        ww = u + kt
        p = jnp.maximum(pp, ww)
        e1 = jnp.exp(pp - p)
        e2 = jnp.exp(ww - p)
        # approx reciprocal: EUP slot, shortest-latency divide on the chain.
        y = (e1 * aa + e2 * vt) * pl.reciprocal(e1 * bb + e2, approx=True)
        o_ref[:, t] = (sr_ref[:, t] * y).astype(o_ref.dtype)
        ww2 = pp + w
        p2 = jnp.maximum(ww2, kt)
        e1b = jnp.exp(ww2 - p2)
        e2b = jnp.exp(kt - p2)
        return (e1b * aa + e2b * vt, e1b * bb + e2b, p2)

    carry = (aa_sc[...], bb_sc[...], pp_sc[...])
    aa, bb, pp = lax.fori_loop(0, nsteps, step, carry,
                               unroll=math.gcd(nsteps, 8))
    aa_sc[...] = aa
    bb_sc[...] = bb
    pp_sc[...] = pp


def pallas_wkv(w_neg_exp, time_first, k, v, sr, *, block=None):
    B, T, D = k.shape
    L = 128 if D % 128 == 0 else D        # lane width
    G = D // L                            # channel groups (sublane packing)
    if block is None:
        bt_target, sub_target = 128, 32
    else:
        bt_target, sub_target = block
    bb, gg, bt = _fit_wkv_blocks(B, T, G, L, budget=_BLOCK_BUDGET,
                                 bt_target=bt_target, sub_target=sub_target)
    grid = (B // bb, G // gg, T // bt)

    data_spec = pl.BlockSpec((bb, bt, gg, L), lambda b, g, t: (b, t, g, 0))
    par_spec = pl.BlockSpec((gg, L), lambda b, g, t: (g, 0))

    out = pl.pallas_call(
        _wkv_kernel,
        out_shape=jax.ShapeDtypeStruct((B, T, G, L), jnp.bfloat16),
        grid=grid,
        in_specs=[data_spec, data_spec, data_spec, par_spec, par_spec],
        out_specs=data_spec,
        scratch_shapes=[pltpu.VMEM((bb, gg, L), jnp.float32) for _ in range(3)],
        compiler_params=_cparams(("parallel", "parallel", "arbitrary")),
    )(k.reshape(B, T, G, L), v.reshape(B, T, G, L),
      sr.reshape(B, T, G, L).astype(jnp.bfloat16),
      w_neg_exp.reshape(G, L), time_first.reshape(G, L))
    return out.reshape(B, T, D)


# ----------------------------------------------------------------------------
# Kernel 3: tiled output projection  (B*T, D) @ (D, C)  with f32 accumulator.
# Consumes the bf16 WKV output directly.
# ----------------------------------------------------------------------------
def _matmul_kernel(x_ref, w_ref, o_ref, acc_ref):
    @pl.when(pl.program_id(2) == 0)
    def _():
        acc_ref[...] = jnp.zeros_like(acc_ref)

    acc_ref[...] += jnp.dot(x_ref[...].astype(jnp.bfloat16), w_ref[...],
                            preferred_element_type=jnp.float32)

    @pl.when(pl.program_id(2) == pl.num_programs(2) - 1)
    def _():
        o_ref[...] = acc_ref[...]


def pallas_matmul(x2, w, *, block=None):
    N, K = x2.shape
    M = w.shape[1]
    if block is None:
        bm, bn, bk = _fit_mm_blocks(N, K, M, n_act=1,
                                    act_bytes=x2.dtype.itemsize, n_w=1,
                                    out_bytes_sum=4, n_acc=1,
                                    budget=_BLOCK_BUDGET)
    else:
        bm, bn, bk = block
    grid = (N // bm, M // bn, K // bk)
    return pl.pallas_call(
        _matmul_kernel,
        out_shape=jax.ShapeDtypeStruct((N, M), jnp.float32),
        grid=grid,
        in_specs=[pl.BlockSpec((bm, bk), lambda i, j, k: (i, k)),
                  pl.BlockSpec((bk, bn), lambda i, j, k: (k, j))],
        out_specs=pl.BlockSpec((bm, bn), lambda i, j, k: (i, j)),
        scratch_shapes=[pltpu.VMEM((bm, bn), jnp.float32)],
        compiler_params=_cparams(("parallel", "parallel", "arbitrary")),
    )(x2, w.astype(jnp.bfloat16))


# ----------------------------------------------------------------------------
# RWKV_TimeMix forward.
# ----------------------------------------------------------------------------
def time_shift(x):
    # nn.ZeroPad2d((0, 0, 1, -1)) on (B, T, C): xx[:, t] = x[:, t-1]; xx[:, 0] = 0
    B, _, C = x.shape
    return jnp.concatenate([jnp.zeros((B, 1, C), x.dtype), x[:, :-1, :]],
                           axis=1)


def rwkv_time_mix(params, x, *, mm_block=None, out_block=None, wkv_block=None):
    B, T, C = x.shape
    D = params["wk"].shape[1]
    # TODO(synk): fuse this one-row shift into the projection kernel (sublane
    # roll + previous-row halo block) to stop materializing / re-streaming xx.
    xx = time_shift(x)
    x2 = x.reshape(B * T, C)
    xx2 = xx.reshape(B * T, C)
    k, v, sr = pallas_time_mix_proj(
        x2, xx2,
        params["time_mix_k"], params["time_mix_v"], params["time_mix_r"],
        params["wk"], params["wv"], params["wr"], block=mm_block)
    # Hoist -exp(time_decay) out of the per-grid-step recurrence.
    w_neg_exp = -jnp.exp(params["time_decay"].astype(jnp.float32))
    y = pallas_wkv(w_neg_exp, params["time_first"],
                   k.reshape(B, T, D), v.reshape(B, T, D),
                   sr.reshape(B, T, D), block=wkv_block)
    out = pallas_matmul(y.reshape(B * T, D), params["wo"],
                        block=out_block if out_block is not None else mm_block)
    return out.reshape(B, T, C)


# ----------------------------------------------------------------------------
# Pure-JAX reference (same bf16 weight quantization as the kernels).
# ----------------------------------------------------------------------------
def wkv_ref(time_decay, time_first, k, v):
    B, T, D = k.shape
    w = -jnp.exp(time_decay.astype(jnp.float32))
    u = time_first.astype(jnp.float32)

    def step(carry, kv):
        aa, bb, pp = carry
        kt, vt = kv
        ww = u + kt
        p = jnp.maximum(pp, ww)
        e1 = jnp.exp(pp - p)
        e2 = jnp.exp(ww - p)
        y = (e1 * aa + e2 * vt) / (e1 * bb + e2)
        ww2 = pp + w
        p2 = jnp.maximum(ww2, kt)
        e1b = jnp.exp(ww2 - p2)
        e2b = jnp.exp(kt - p2)
        return (e1b * aa + e2b * vt, e1b * bb + e2b, p2), y

    init = (jnp.zeros((B, D), jnp.float32), jnp.zeros((B, D), jnp.float32),
            jnp.full((B, D), -1e38, jnp.float32))
    _, ys = lax.scan(step, init, (jnp.swapaxes(k, 0, 1), jnp.swapaxes(v, 0, 1)))
    return jnp.swapaxes(ys, 0, 1)


def rwkv_time_mix_ref(p, x):
    B, T, C = x.shape
    xx = time_shift(x)

    def mm(a, w):
        out = jnp.dot(a.reshape(-1, a.shape[-1]).astype(jnp.bfloat16),
                      w.astype(jnp.bfloat16),
                      preferred_element_type=jnp.float32)
        return out.reshape(B, T, -1)

    mk, mv, mr = p["time_mix_k"], p["time_mix_v"], p["time_mix_r"]
    xk = x * mk + xx * (1.0 - mk)
    xv = x * mv + xx * (1.0 - mv)
    xr = x * mr + xx * (1.0 - mr)
    k = mm(xk, p["wk"])
    v = mm(xv, p["wv"])
    r = mm(xr, p["wr"])
    sr = 1.0 / (1.0 + jnp.exp(-r))
    y = wkv_ref(p["time_decay"], p["time_first"], k, v)
    return mm(sr * y, p["wo"])


# ----------------------------------------------------------------------------
# Deterministic parameter init (shapes / formulas per RWKV_TimeMix.__init__).
# ----------------------------------------------------------------------------
def init_time_mix_params(key, *, n_embd, dim_att, n_layer, layer_id):
    r0_1 = layer_id / (n_layer - 1)
    r1_a0 = 1.0 - layer_id / n_layer
    ddd = (jnp.arange(n_embd, dtype=jnp.float32) / n_embd)[None, :]      # (1, C)
    h = jnp.arange(dim_att, dtype=jnp.float32)
    decay_speed = -5.0 + 8.0 * (h / (dim_att - 1)) ** (0.7 + 1.3 * r0_1)
    zigzag = jnp.array([((i + 1) % 3 - 1) * 0.5 for i in range(dim_att)],
                       jnp.float32)
    k1, k2, k3, k4 = jax.random.split(key, 4)

    def lin(k, fan_in, fan_out):
        # nn.Linear(fan_in, fan_out, bias=False), stored as (in, out)
        return (jax.random.normal(k, (fan_in, fan_out), jnp.float32)
                / math.sqrt(fan_in))

    return {
        "time_decay": decay_speed,                                       # (D,)
        "time_first": jnp.full((dim_att,), math.log(0.3), jnp.float32) + zigzag,
        "time_mix_k": ddd ** r1_a0,                                      # (1, C)
        "time_mix_v": ddd ** r1_a0 + 0.3 * r0_1,
        "time_mix_r": ddd ** (0.5 * r1_a0),
        "wk": lin(k1, n_embd, dim_att),
        "wv": lin(k2, n_embd, dim_att),
        "wr": lin(k3, n_embd, dim_att),
        "wo": lin(k4, dim_att, n_embd),
    }


# ----------------------------------------------------------------------------
if __name__ == "__main__":
    root = jax.random.PRNGKey(0)
    kp1, kx1, kp2, kx2 = jax.random.split(root, 4)

    # --- case 1: small shapes consistent with the module (auto tiling) ---
    B, T, C, D = 2, 8, 32, 32
    params = init_time_mix_params(kp1, n_embd=C, dim_att=D,
                                  n_layer=2, layer_id=1)
    x = jax.random.normal(kx1, (B, T, C), jnp.float32)
    out = jax.block_until_ready(jax.jit(rwkv_time_mix)(params, x))
    assert out.shape == (B, T, C)
    assert bool(jnp.all(jnp.isfinite(out)))
    ref = rwkv_time_mix_ref(params, x)
    err = float(jnp.max(jnp.abs(out - ref)) / (jnp.max(jnp.abs(ref)) + 1e-6))
    assert err < 2e-2, f"toy-case mismatch (rel err {err})"

    # --- case 2: moderate shapes with small tile targets so every grid axis
    #     is > 1 (exercises K-accumulation, the j output-tile axis, the WKV
    #     batch/channel blocking and its time-chunk state carry) ---
    B2, T2, C2, D2 = 2, 96, 256, 256
    params2 = init_time_mix_params(kp2, n_embd=C2, dim_att=D2,
                                   n_layer=4, layer_id=2)
    x2 = jax.random.normal(kx2, (B2, T2, C2), jnp.float32)
    fwd2 = jax.jit(functools.partial(rwkv_time_mix,
                                     mm_block=(32, 128, 128),
                                     wkv_block=(32, 4)))
    out2 = jax.block_until_ready(fwd2(params2, x2))
    assert out2.shape == (B2, T2, C2)
    ref2 = rwkv_time_mix_ref(params2, x2)
    err2 = float(jnp.max(jnp.abs(out2 - ref2)) / (jnp.max(jnp.abs(ref2)) + 1e-6))
    assert err2 < 2e-2, f"tiled-case mismatch (rel err {err2})"

    print("KERNEL_OK")
</pallas_src>

<mosaic_0001>
module attributes {stable_mosaic.version = 11 : i64} {
  func.func @_tm_proj_kernel(%arg0: i32, %arg1: i32, %arg2: i32, %arg3: memref<16x32xf32, #tpu.memory_space<vmem>>, %arg4: memref<16x32xf32, #tpu.memory_space<vmem>>, %arg5: memref<1x32xf32, #tpu.memory_space<vmem>>, %arg6: memref<1x32xf32, #tpu.memory_space<vmem>>, %arg7: memref<1x32xf32, #tpu.memory_space<vmem>>, %arg8: memref<32x32xbf16, #tpu.memory_space<vmem>>, %arg9: memref<32x32xbf16, #tpu.memory_space<vmem>>, %arg10: memref<32x32xbf16, #tpu.memory_space<vmem>>, %arg11: memref<16x32xf32, #tpu.memory_space<vmem>>, %arg12: memref<16x32xf32, #tpu.memory_space<vmem>>, %arg13: memref<16x32xbf16, #tpu.memory_space<vmem>>, %arg14: memref<16x32xf32, #tpu.memory_space<vmem>>, %arg15: memref<16x32xf32, #tpu.memory_space<vmem>>, %arg16: memref<16x32xf32, #tpu.memory_space<vmem>>) attributes {dimension_semantics = [#tpu.dimension_semantics<parallel>, #tpu.dimension_semantics<parallel>, #tpu.dimension_semantics<arbitrary>], iteration_bounds = array<i64: 1, 1, 1>, scalar_prefetch = 0 : i64, scratch_operands = 3 : i64, tpu.core_type = #tpu.core_type<tc>, window_params = [{transform_indices = @transform_0, window_bounds = array<i64: 16, 32>}, {transform_indices = @transform_1, window_bounds = array<i64: 16, 32>}, {transform_indices = @transform_2, window_bounds = array<i64: 1, 32>}, {transform_indices = @transform_3, window_bounds = array<i64: 1, 32>}, {transform_indices = @transform_4, window_bounds = array<i64: 1, 32>}, {transform_indices = @transform_5, window_bounds = array<i64: 32, 32>}, {transform_indices = @transform_6, window_bounds = array<i64: 32, 32>}, {transform_indices = @transform_7, window_bounds = array<i64: 32, 32>}, {transform_indices = @transform_8, window_bounds = array<i64: 16, 32>}, {transform_indices = @transform_9, window_bounds = array<i64: 16, 32>}, {transform_indices = @transform_10, window_bounds = array<i64: 16, 32>}]} {
    %c0_i32 = arith.constant 0 : i32
    %0 = arith.cmpi eq, %arg2, %c0_i32 : i32
    %1 = arith.extui %0 : i1 to i32
    %c0_i32_0 = arith.constant 0 : i32
    %2 = arith.cmpi ne, %1, %c0_i32_0 : i32
    scf.if %2 {
      %cst_32 = arith.constant 0.000000e+00 : f32
      %39 = vector.broadcast %cst_32 : f32 to vector<16x32xf32>
      %c0_33 = arith.constant 0 : index
      %c0_34 = arith.constant 0 : index
      %40 = vector.load %arg14[%c0_33, %c0_34] : memref<16x32xf32, #tpu.memory_space<vmem>>, vector<16x32xf32>
      tpu.vector_store %arg14[%c0_33, %c0_34], %39 {strides = array<i32>} : memref<16x32xf32, #tpu.memory_space<vmem>>, vector<16x32xf32>,
      %cst_35 = arith.constant 0.000000e+00 : f32
      %41 = vector.broadcast %cst_35 : f32 to vector<16x32xf32>
      %c0_36 = arith.constant 0 : index
      %c0_37 = arith.constant 0 : index
      %42 = vector.load %arg15[%c0_36, %c0_37] : memref<16x32xf32, #tpu.memory_space<vmem>>, vector<16x32xf32>
      tpu.vector_store %arg15[%c0_36, %c0_37], %41 {strides = array<i32>} : memref<16x32xf32, #tpu.memory_space<vmem>>, vector<16x32xf32>,
      %cst_38 = arith.constant 0.000000e+00 : f32
      %43 = vector.broadcast %cst_38 : f32 to vector<16x32xf32>
      %c0_39 = arith.constant 0 : index
      %c0_40 = arith.constant 0 : index
      %44 = vector.load %arg16[%c0_39, %c0_40] : memref<16x32xf32, #tpu.memory_space<vmem>>, vector<16x32xf32>
      tpu.vector_store %arg16[%c0_39, %c0_40], %43 {strides = array<i32>} : memref<16x32xf32, #tpu.memory_space<vmem>>, vector<16x32xf32>,
    } else {
    }
    %c0 = arith.constant 0 : index
    %c0_1 = arith.constant 0 : index
    %3 = vector.load %arg3[%c0, %c0_1] : memref<16x32xf32, #tpu.memory_space<vmem>>, vector<16x32xf32>
    %c0_2 = arith.constant 0 : index
    %c0_3 = arith.constant 0 : index
    %4 = vector.load %arg4[%c0_2, %c0_3] : memref<16x32xf32, #tpu.memory_space<vmem>>, vector<16x32xf32>
    %5 = arith.subf %3, %4 : vector<16x32xf32>
    %c0_4 = arith.constant 0 : index
    %c0_5 = arith.constant 0 : index
    %6 = vector.load %arg5[%c0_4, %c0_5] : memref<1x32xf32, #tpu.memory_space<vmem>>, vector<1x32xf32>
    %7 = vector.broadcast %6 : vector<1x32xf32> to vector<16x32xf32>
    %8 = arith.mulf %7, %5 : vector<16x32xf32>
    %9 = arith.addf %4, %8 : vector<16x32xf32>
    %10 = arith.truncf %9 : vector<16x32xf32> to vector<16x32xbf16>
    %c0_6 = arith.constant 0 : index
    %c0_7 = arith.constant 0 : index
    %11 = vector.load %arg6[%c0_6, %c0_7] : memref<1x32xf32, #tpu.memory_space<vmem>>, vector<1x32xf32>
    %12 = vector.broadcast %11 : vector<1x32xf32> to vector<16x32xf32>
    %13 = arith.mulf %12, %5 : vector<16x32xf32>
    %14 = arith.addf %4, %13 : vector<16x32xf32>
    %15 = arith.truncf %14 : vector<16x32xf32> to vector<16x32xbf16>
    %c0_8 = arith.constant 0 : index
    %c0_9 = arith.constant 0 : index
    %16 = vector.load %arg7[%c0_8, %c0_9] : memref<1x32xf32, #tpu.memory_space<vmem>>, vector<1x32xf32>
    %17 = vector.broadcast %16 : vector<1x32xf32> to vector<16x32xf32>
    %18 = arith.mulf %17, %5 : vector<16x32xf32>
    %19 = arith.addf %4, %18 : vector<16x32xf32>
    %20 = arith.truncf %19 : vector<16x32xf32> to vector<16x32xbf16>
    %c0_10 = arith.constant 0 : index
    %c0_11 = arith.constant 0 : index
    %21 = vector.load %arg14[%c0_10, %c0_11] : memref<16x32xf32, #tpu.memory_space<vmem>>, vector<16x32xf32>
    %c0_12 = arith.constant 0 : index
    %c0_13 = arith.constant 0 : index
    %22 = vector.load %arg8[%c0_12, %c0_13] : memref<32x32xbf16, #tpu.memory_space<vmem>>, vector<32x32xbf16>
    %cst = arith.constant dense<0.000000e+00> : vector<16x32xf32>
    %23 = tpu.matmul %10, %22, %cst {dimension_numbers = #tpu.dot_dimension_numbers<[1], [0], [0], [1], [0, 0, 1, 1], [], []>} : vector<16x32xbf16>, vector<32x32xbf16>, vector<16x32xf32> -> vector<16x32xf32>
    %24 = arith.addf %21, %23 : vector<16x32xf32>
    %c0_14 = arith.constant 0 : index
    %c0_15 = arith.constant 0 : index
    %25 = vector.load %arg14[%c0_14, %c0_15] : memref<16x32xf32, #tpu.memory_space<vmem>>, vector<16x32xf32>
    tpu.vector_store %arg14[%c0_14, %c0_15], %24 {strides = array<i32>} : memref<16x32xf32, #tpu.memory_space<vmem>>, vector<16x32xf32>,
    %c0_16 = arith.constant 0 : index
    %c0_17 = arith.constant 0 : index
    %26 = vector.load %arg15[%c0_16, %c0_17] : memref<16x32xf32, #tpu.memory_space<vmem>>, vector<16x32xf32>
    %c0_18 = arith.constant 0 : index
    %c0_19 = arith.constant 0 : index
    %27 = vector.load %arg9[%c0_18, %c0_19] : memref<32x32xbf16, #tpu.memory_space<vmem>>, vector<32x32xbf16>
    %cst_20 = arith.constant dense<0.000000e+00> : vector<16x32xf32>
    %28 = tpu.matmul %15, %27, %cst_20 {dimension_numbers = #tpu.dot_dimension_numbers<[1], [0], [0], [1], [0, 0, 1, 1], [], []>} : vector<16x32xbf16>, vector<32x32xbf16>, vector<16x32xf32> -> vector<16x32xf32>
    %29 = arith.addf %26, %28 : vector<16x32xf32>
    %c0_21 = arith.constant 0 : index
    %c0_22 = arith.constant 0 : index
    %30 = vector.load %arg15[%c0_21, %c0_22] : memref<16x32xf32, #tpu.memory_space<vmem>>, vector<16x32xf32>
    tpu.vector_store %arg15[%c0_21, %c0_22], %29 {strides = array<i32>} : memref<16x32xf32, #tpu.memory_space<vmem>>, vector<16x32xf32>,
    %c0_23 = arith.constant 0 : index
    %c0_24 = arith.constant 0 : index
    %31 = vector.load %arg16[%c0_23, %c0_24] : memref<16x32xf32, #tpu.memory_space<vmem>>, vector<16x32xf32>
    %c0_25 = arith.constant 0 : index
    %c0_26 = arith.constant 0 : index
    %32 = vector.load %arg10[%c0_25, %c0_26] : memref<32x32xbf16, #tpu.memory_space<vmem>>, vector<32x32xbf16>
    %cst_27 = arith.constant dense<0.000000e+00> : vector<16x32xf32>
    %33 = tpu.matmul %20, %32, %cst_27 {dimension_numbers = #tpu.dot_dimension_numbers<[1], [0], [0], [1], [0, 0, 1, 1], [], []>} : vector<16x32xbf16>, vector<32x32xbf16>, vector<16x32xf32> -> vector<16x32xf32>
    %34 = arith.addf %31, %33 : vector<16x32xf32>
    %c0_28 = arith.constant 0 : index
    %c0_29 = arith.constant 0 : index
    %35 = vector.load %arg16[%c0_28, %c0_29] : memref<16x32xf32, #tpu.memory_space<vmem>>, vector<16x32xf32>
    tpu.vector_store %arg16[%c0_28, %c0_29], %34 {strides = array<i32>} : memref<16x32xf32, #tpu.memory_space<vmem>>, vector<16x32xf32>,
    %c0_i32_30 = arith.constant 0 : i32
    %36 = arith.cmpi eq, %arg2, %c0_i32_30 : i32
    %37 = arith.extui %36 : i1 to i32
    %c0_i32_31 = arith.constant 0 : i32
    %38 = arith.cmpi ne, %37, %c0_i32_31 : i32
    scf.if %38 {
      %c0_32 = arith.constant 0 : index
      %c0_33 = arith.constant 0 : index
      %39 = vector.load %arg14[%c0_32, %c0_33] : memref<16x32xf32, #tpu.memory_space<vmem>>, vector<16x32xf32>
      %c0_34 = arith.constant 0 : index
      %c0_35 = arith.constant 0 : index
      %40 = vector.load %arg11[%c0_34, %c0_35] : memref<16x32xf32, #tpu.memory_space<vmem>>, vector<16x32xf32>
      tpu.vector_store %arg11[%c0_34, %c0_35], %39 {strides = array<i32>} : memref<16x32xf32, #tpu.memory_space<vmem>>, vector<16x32xf32>,
      %c0_36 = arith.constant 0 : index
      %c0_37 = arith.constant 0 : index
      %41 = vector.load %arg15[%c0_36, %c0_37] : memref<16x32xf32, #tpu.memory_space<vmem>>, vector<16x32xf32>
      %c0_38 = arith.constant 0 : index
      %c0_39 = arith.constant 0 : index
      %42 = vector.load %arg12[%c0_38, %c0_39] : memref<16x32xf32, #tpu.memory_space<vmem>>, vector<16x32xf32>
      tpu.vector_store %arg12[%c0_38, %c0_39], %41 {strides = array<i32>} : memref<16x32xf32, #tpu.memory_space<vmem>>, vector<16x32xf32>,
      %c0_40 = arith.constant 0 : index
      %c0_41 = arith.constant 0 : index
      %43 = vector.load %arg16[%c0_40, %c0_41] : memref<16x32xf32, #tpu.memory_space<vmem>>, vector<16x32xf32>
      %cst_42 = arith.constant 0.000000e+00 : f32
      %44 = vector.broadcast %cst_42 : f32 to vector<16x32xf32>
      %45 = arith.subf %44, %43 : vector<16x32xf32>
      %46 = math.exp %45 : vector<16x32xf32>
      %cst_43 = arith.constant 1.000000e+00 : f32
      %47 = vector.broadcast %cst_43 : f32 to vector<16x32xf32>
      %48 = arith.addf %47, %46 : vector<16x32xf32>
      %49 = tpu.reciprocal %48 {approx = true} : vector<16x32xf32> -> vector<16x32xf32>
      %50 = arith.truncf %49 : vector<16x32xf32> to vector<16x32xbf16>
      %c0_44 = arith.constant 0 : index
      %c0_45 = arith.constant 0 : index
      %51 = vector.load %arg13[%c0_44, %c0_45] : memref<16x32xbf16, #tpu.memory_space<vmem>>, vector<16x32xbf16>
      tpu.vector_store %arg13[%c0_44, %c0_45], %50 {strides = array<i32>} : memref<16x32xbf16, #tpu.memory_space<vmem>>, vector<16x32xbf16>,
    } else {
    }
    return
  }
  func.func @transform_0(%arg0: i32, %arg1: i32, %arg2: i32) -> (i32, i32) {
    %c0_i32 = arith.constant 0 : i32
    return %arg0, %arg2 : i32, i32
  }
  func.func @transform_1(%arg0: i32, %arg1: i32, %arg2: i32) -> (i32, i32) {
    %c0_i32 = arith.constant 0 : i32
    return %arg0, %arg2 : i32, i32
  }
  func.func @transform_2(%arg0: i32, %arg1: i32, %arg2: i32) -> (i32, i32) {
    %c0_i32 = arith.constant 0 : i32
    %c0_i32_0 = arith.constant 0 : i32
    return %c0_i32, %arg2 : i32, i32
  }
  func.func @transform_3(%arg0: i32, %arg1: i32, %arg2: i32) -> (i32, i32) {
    %c0_i32 = arith.constant 0 : i32
    %c0_i32_0 = arith.constant 0 : i32
    return %c0_i32, %arg2 : i32, i32
  }
  func.func @transform_4(%arg0: i32, %arg1: i32, %arg2: i32) -> (i32, i32) {
    %c0_i32 = arith.constant 0 : i32
    %c0_i32_0 = arith.constant 0 : i32
    return %c0_i32, %arg2 : i32, i32
  }
  func.func @transform_5(%arg0: i32, %arg1: i32, %arg2: i32) -> (i32, i32) {
    %c0_i32 = arith.constant 0 : i32
    return %arg2, %arg1 : i32, i32
  }
  func.func @transform_6(%arg0: i32, %arg1: i32, %arg2: i32) -> (i32, i32) {
    %c0_i32 = arith.constant 0 : i32
    return %arg2, %arg1 : i32, i32
  }
  func.func @transform_7(%arg0: i32, %arg1: i32, %arg2: i32) -> (i32, i32) {
    %c0_i32 = arith.constant 0 : i32
    return %arg2, %arg1 : i32, i32
  }
  func.func @transform_8(%arg0: i32, %arg1: i32, %arg2: i32) -> (i32, i32) {
    %c0_i32 = arith.constant 0 : i32
    return %arg0, %arg1 : i32, i32
  }
  func.func @transform_9(%arg0: i32, %arg1: i32, %arg2: i32) -> (i32, i32) {
    %c0_i32 = arith.constant 0 : i32
    return %arg0, %arg1 : i32, i32
  }
  func.func @transform_10(%arg0: i32, %arg1: i32, %arg2: i32) -> (i32, i32) {
    %c0_i32 = arith.constant 0 : i32
    return %arg0, %arg1 : i32, i32
  }
}

module attributes {stable_mosaic.version = 11 : i64} {
  func.func @_matmul_kernel(%arg0: i32, %arg1: i32, %arg2: i32, %arg3: memref<16x32xbf16, #tpu.memory_space<vmem>>, %arg4: memref<32x32xbf16, #tpu.memory_space<vmem>>, %arg5: memref<16x32xf32, #tpu.memory_space<vmem>>, %arg6: memref<16x32xf32, #tpu.memory_space<vmem>>) attributes {dimension_semantics = [#tpu.dimension_semantics<parallel>, #tpu.dimension_semantics<parallel>, #tpu.dimension_semantics<arbitrary>], iteration_bounds = array<i64: 1, 1, 1>, scalar_prefetch = 0 : i64, scratch_operands = 1 : i64, tpu.core_type = #tpu.core_type<tc>, window_params = [{transform_indices = @transform_0, window_bounds = array<i64: 16, 32>}, {transform_indices = @transform_1, window_bounds = array<i64: 32, 32>}, {transform_indices = @transform_2, window_bounds = array<i64: 16, 32>}]} {
    %c0_i32 = arith.constant 0 : i32
    %0 = arith.cmpi eq, %arg2, %c0_i32 : i32
    %1 = arith.extui %0 : i1 to i32
    %c0_i32_0 = arith.constant 0 : i32
    %2 = arith.cmpi ne, %1, %c0_i32_0 : i32
    scf.if %2 {
      %cst_10 = arith.constant 0.000000e+00 : f32
      %12 = vector.broadcast %cst_10 : f32 to vector<16x32xf32>
      %c0_11 = arith.constant 0 : index
      %c0_12 = arith.constant 0 : index
      %13 = vector.load %arg6[%c0_11, %c0_12] : memref<16x32xf32, #tpu.memory_space<vmem>>, vector<16x32xf32>
      tpu.vector_store %arg6[%c0_11, %c0_12], %12 {strides = array<i32>} : memref<16x32xf32, #tpu.memory_space<vmem>>, vector<16x32xf32>,
    } else {
    }
    %c0 = arith.constant 0 : index
    %c0_1 = arith.constant 0 : index
    %3 = vector.load %arg6[%c0, %c0_1] : memref<16x32xf32, #tpu.memory_space<vmem>>, vector<16x32xf32>
    %c0_2 = arith.constant 0 : index
    %c0_3 = arith.constant 0 : index
    %4 = vector.load %arg3[%c0_2, %c0_3] : memref<16x32xbf16, #tpu.memory_space<vmem>>, vector<16x32xbf16>
    %c0_4 = arith.constant 0 : index
    %c0_5 = arith.constant 0 : index
    %5 = vector.load %arg4[%c0_4, %c0_5] : memref<32x32xbf16, #tpu.memory_space<vmem>>, vector<32x32xbf16>
    %cst = arith.constant dense<0.000000e+00> : vector<16x32xf32>
    %6 = tpu.matmul %4, %5, %cst {dimension_numbers = #tpu.dot_dimension_numbers<[1], [0], [0], [1], [0, 0, 1, 1], [], []>} : vector<16x32xbf16>, vector<32x32xbf16>, vector<16x32xf32> -> vector<16x32xf32>
    %7 = arith.addf %3, %6 : vector<16x32xf32>
    %c0_6 = arith.constant 0 : index
    %c0_7 = arith.constant 0 : index
    %8 = vector.load %arg6[%c0_6, %c0_7] : memref<16x32xf32, #tpu.memory_space<vmem>>, vector<16x32xf32>
    tpu.vector_store %arg6[%c0_6, %c0_7], %7 {strides = array<i32>} : memref<16x32xf32, #tpu.memory_space<vmem>>, vector<16x32xf32>,
    %c0_i32_8 = arith.constant 0 : i32
    %9 = arith.cmpi eq, %arg2, %c0_i32_8 : i32
    %10 = arith.extui %9 : i1 to i32
    %c0_i32_9 = arith.constant 0 : i32
    %11 = arith.cmpi ne, %10, %c0_i32_9 : i32
    scf.if %11 {
      %c0_10 = arith.constant 0 : index
      %c0_11 = arith.constant 0 : index
      %12 = vector.load %arg6[%c0_10, %c0_11] : memref<16x32xf32, #tpu.memory_space<vmem>>, vector<16x32xf32>
      %c0_12 = arith.constant 0 : index
      %c0_13 = arith.constant 0 : index
      %13 = vector.load %arg5[%c0_12, %c0_13] : memref<16x32xf32, #tpu.memory_space<vmem>>, vector<16x32xf32>
      tpu.vector_store %arg5[%c0_12, %c0_13], %12 {strides = array<i32>} : memref<16x32xf32, #tpu.memory_space<vmem>>, vector<16x32xf32>,
    } else {
    }
    return
  }
  func.func @transform_0(%arg0: i32, %arg1: i32, %arg2: i32) -> (i32, i32) {
    %c0_i32 = arith.constant 0 : i32
    return %arg0, %arg2 : i32, i32
  }
  func.func @transform_1(%arg0: i32, %arg1: i32, %arg2: i32) -> (i32, i32) {
    %c0_i32 = arith.constant 0 : i32
    return %arg2, %arg1 : i32, i32
  }
  func.func @transform_2(%arg0: i32, %arg1: i32, %arg2: i32) -> (i32, i32) {
    %c0_i32 = arith.constant 0 : i32
    return %arg0, %arg1 : i32, i32
  }
}

module attributes {stable_mosaic.version = 11 : i64} {
  func.func @_wkv_kernel(%arg0: i32, %arg1: i32, %arg2: i32, %arg3: memref<2x8x1x32xf32, #tpu.memory_space<vmem>>, %arg4: memref<2x8x1x32xf32, #tpu.memory_space<vmem>>, %arg5: memref<2x8x1x32xbf16, #tpu.memory_space<vmem>>, %arg6: memref<1x32xf32, #tpu.memory_space<vmem>>, %arg7: memref<1x32xf32, #tpu.memory_space<vmem>>, %arg8: memref<2x8x1x32xbf16, #tpu.memory_space<vmem>>, %arg9: memref<2x1x32xf32, #tpu.memory_space<vmem>>, %arg10: memref<2x1x32xf32, #tpu.memory_space<vmem>>, %arg11: memref<2x1x32xf32, #tpu.memory_space<vmem>>) attributes {dimension_semantics = [#tpu.dimension_semantics<parallel>, #tpu.dimension_semantics<parallel>, #tpu.dimension_semantics<arbitrary>], iteration_bounds = array<i64: 1, 1, 1>, scalar_prefetch = 0 : i64, scratch_operands = 3 : i64, tpu.core_type = #tpu.core_type<tc>, window_params = [{transform_indices = @transform_0, window_bounds = array<i64: 2, 8, 1, 32>}, {transform_indices = @transform_1, window_bounds = array<i64: 2, 8, 1, 32>}, {transform_indices = @transform_2, window_bounds = array<i64: 2, 8, 1, 32>}, {transform_indices = @transform_3, window_bounds = array<i64: 1, 32>}, {transform_indices = @transform_4, window_bounds = array<i64: 1, 32>}, {transform_indices = @transform_5, window_bounds = array<i64: 2, 8, 1, 32>}]} {
    %c0_i32 = arith.constant 0 : i32
    %0 = arith.cmpi eq, %arg2, %c0_i32 : i32
    %1 = arith.extui %0 : i1 to i32
    %c0_i32_0 = arith.constant 0 : i32
    %2 = arith.cmpi ne, %1, %c0_i32_0 : i32
    scf.if %2 {
      %cst = arith.constant 0.000000e+00 : f32
      %363 = vector.broadcast %cst : f32 to vector<2x1x32xf32>
      %c0_119 = arith.constant 0 : index
      %c0_120 = arith.constant 0 : index
      %c0_121 = arith.constant 0 : index
      %364 = vector.load %arg9[%c0_119, %c0_120, %c0_121] : memref<2x1x32xf32, #tpu.memory_space<vmem>>, vector<2x1x32xf32>
      tpu.vector_store %arg9[%c0_119, %c0_120, %c0_121], %363 {strides = array<i32>} : memref<2x1x32xf32, #tpu.memory_space<vmem>>, vector<2x1x32xf32>,
      %cst_122 = arith.constant 0.000000e+00 : f32
      %365 = vector.broadcast %cst_122 : f32 to vector<2x1x32xf32>
      %c0_123 = arith.constant 0 : index
      %c0_124 = arith.constant 0 : index
      %c0_125 = arith.constant 0 : index
      %366 = vector.load %arg10[%c0_123, %c0_124, %c0_125] : memref<2x1x32xf32, #tpu.memory_space<vmem>>, vector<2x1x32xf32>
      tpu.vector_store %arg10[%c0_123, %c0_124, %c0_125], %365 {strides = array<i32>} : memref<2x1x32xf32, #tpu.memory_space<vmem>>, vector<2x1x32xf32>,
      %cst_126 = arith.constant -9.99999968E+37 : f32
      %367 = vector.broadcast %cst_126 : f32 to vector<2x1x32xf32>
      %c0_127 = arith.constant 0 : index
      %c0_128 = arith.constant 0 : index
      %c0_129 = arith.constant 0 : index
      %368 = vector.load %arg11[%c0_127, %c0_128, %c0_129] : memref<2x1x32xf32, #tpu.memory_space<vmem>>, vector<2x1x32xf32>
      tpu.vector_store %arg11[%c0_127, %c0_128, %c0_129], %367 {strides = array<i32>} : memref<2x1x32xf32, #tpu.memory_space<vmem>>, vector<2x1x32xf32>,
    } else {
    }
    %c0 = arith.constant 0 : index
    %c0_1 = arith.constant 0 : index
    %3 = vector.load %arg6[%c0, %c0_1] : memref<1x32xf32, #tpu.memory_space<vmem>>, vector<1x32xf32>
    %c0_2 = arith.constant 0 : index
    %c0_3 = arith.constant 0 : index
    %4 = vector.load %arg7[%c0_2, %c0_3] : memref<1x32xf32, #tpu.memory_space<vmem>>, vector<1x32xf32>
    %c0_4 = arith.constant 0 : index
    %c0_5 = arith.constant 0 : index
    %c0_6 = arith.constant 0 : index
    %5 = vector.load %arg9[%c0_4, %c0_5, %c0_6] : memref<2x1x32xf32, #tpu.memory_space<vmem>>, vector<2x1x32xf32>
    %c0_7 = arith.constant 0 : index
    %c0_8 = arith.constant 0 : index
    %c0_9 = arith.constant 0 : index
    %6 = vector.load %arg10[%c0_7, %c0_8, %c0_9] : memref<2x1x32xf32, #tpu.memory_space<vmem>>, vector<2x1x32xf32>
    %c0_10 = arith.constant 0 : index
    %c0_11 = arith.constant 0 : index
    %c0_12 = arith.constant 0 : index
    %7 = vector.load %arg11[%c0_10, %c0_11, %c0_12] : memref<2x1x32xf32, #tpu.memory_space<vmem>>, vector<2x1x32xf32>
    %c0_i32_13 = arith.constant 0 : i32
    %c0_14 = arith.constant 0 : index
    %8 = arith.index_cast %c0_i32_13 : i32 to index
    %c0_15 = arith.constant 0 : index
    %c0_16 = arith.constant 0 : index
    %9 = vector.load %arg3[%c0_14, %8, %c0_15, %c0_16] : memref<2x8x1x32xf32, #tpu.memory_space<vmem>>, vector<2x1x1x32xf32>
    %10 = vector.shape_cast %9 : vector<2x1x1x32xf32> to vector<2x1x32xf32>
    %c0_17 = arith.constant 0 : index
    %11 = arith.index_cast %c0_i32_13 : i32 to index
    %c0_18 = arith.constant 0 : index
    %c0_19 = arith.constant 0 : index
    %12 = vector.load %arg4[%c0_17, %11, %c0_18, %c0_19] : memref<2x8x1x32xf32, #tpu.memory_space<vmem>>, vector<2x1x1x32xf32>
    %13 = vector.shape_cast %12 : vector<2x1x1x32xf32> to vector<2x1x32xf32>
    %14 = vector.shape_cast %4 : vector<1x32xf32> to vector<1x1x32xf32>
    %15 = vector.broadcast %14 : vector<1x1x32xf32> to vector<2x1x32xf32>
    %16 = arith.addf %15, %10 : vector<2x1x32xf32>
    %17 = arith.maximumf %7, %16 : vector<2x1x32xf32>
    %18 = arith.subf %7, %17 : vector<2x1x32xf32>
    %19 = math.exp %18 : vector<2x1x32xf32>
    %20 = arith.subf %16, %17 : vector<2x1x32xf32>
    %21 = math.exp %20 : vector<2x1x32xf32>
    %22 = arith.mulf %19, %5 : vector<2x1x32xf32>
    %23 = arith.mulf %21, %13 : vector<2x1x32xf32>
    %24 = arith.addf %22, %23 : vector<2x1x32xf32>
    %25 = arith.mulf %19, %6 : vector<2x1x32xf32>
    %26 = arith.addf %25, %21 : vector<2x1x32xf32>
    %27 = tpu.reciprocal %26 {approx = true} : vector<2x1x32xf32> -> vector<2x1x32xf32>
    %28 = arith.mulf %24, %27 : vector<2x1x32xf32>
    %c0_20 = arith.constant 0 : index
    %29 = arith.index_cast %c0_i32_13 : i32 to index
    %c0_21 = arith.constant 0 : index
    %c0_22 = arith.constant 0 : index
    %30 = vector.load %arg5[%c0_20, %29, %c0_21, %c0_22] : memref<2x8x1x32xbf16, #tpu.memory_space<vmem>>, vector<2x1x1x32xbf16>
    %31 = vector.shape_cast %30 : vector<2x1x1x32xbf16> to vector<2x1x32xbf16>
    %32 = arith.extf %31 : vector<2x1x32xbf16> to vector<2x1x32xf32>
    %33 = arith.mulf %32, %28 : vector<2x1x32xf32>
    %34 = arith.truncf %33 : vector<2x1x32xf32> to vector<2x1x32xbf16>
    %c0_23 = arith.constant 0 : index
    %35 = arith.index_cast %c0_i32_13 : i32 to index
    %c0_24 = arith.constant 0 : index
    %c0_25 = arith.constant 0 : index
    %36 = vector.load %arg8[%c0_23, %35, %c0_24, %c0_25] : memref<2x8x1x32xbf16, #tpu.memory_space<vmem>>, vector<2x1x1x32xbf16>
    %37 = vector.shape_cast %36 : vector<2x1x1x32xbf16> to vector<2x1x32xbf16>
    %38 = vector.shape_cast %34 : vector<2x1x32xbf16> to vector<2x1x1x32xbf16>
    tpu.vector_store %arg8[%c0_23, %35, %c0_24, %c0_25], %38 {strides = array<i32>} : memref<2x8x1x32xbf16, #tpu.memory_space<vmem>>, vector<2x1x1x32xbf16>,
    %39 = vector.shape_cast %3 : vector<1x32xf32> to vector<1x1x32xf32>
    %40 = vector.broadcast %39 : vector<1x1x32xf32> to vector<2x1x32xf32>
    %41 = arith.addf %7, %40 : vector<2x1x32xf32>
    %42 = arith.maximumf %41, %10 : vector<2x1x32xf32>
    %43 = arith.subf %41, %42 : vector<2x1x32xf32>
    %44 = math.exp %43 : vector<2x1x32xf32>
    %45 = arith.subf %10, %42 : vector<2x1x32xf32>
    %46 = math.exp %45 : vector<2x1x32xf32>
    %47 = arith.mulf %44, %5 : vector<2x1x32xf32>
    %48 = arith.mulf %46, %13 : vector<2x1x32xf32>
    %49 = arith.addf %47, %48 : vector<2x1x32xf32>
    %50 = arith.mulf %44, %6 : vector<2x1x32xf32>
    %51 = arith.addf %50, %46 : vector<2x1x32xf32>
    %c1_i32 = arith.constant 1 : i32
    %c0_26 = arith.constant 0 : index
    %52 = arith.index_cast %c1_i32 : i32 to index
    %c0_27 = arith.constant 0 : index
    %c0_28 = arith.constant 0 : index
    %53 = vector.load %arg3[%c0_26, %52, %c0_27, %c0_28] : memref<2x8x1x32xf32, #tpu.memory_space<vmem>>, vector<2x1x1x32xf32>
    %54 = vector.shape_cast %53 : vector<2x1x1x32xf32> to vector<2x1x32xf32>
    %c0_29 = arith.constant 0 : index
    %55 = arith.index_cast %c1_i32 : i32 to index
    %c0_30 = arith.constant 0 : index
    %c0_31 = arith.constant 0 : index
    %56 = vector.load %arg4[%c0_29, %55, %c0_30, %c0_31] : memref<2x8x1x32xf32, #tpu.memory_space<vmem>>, vector<2x1x1x32xf32>
    %57 = vector.shape_cast %56 : vector<2x1x1x32xf32> to vector<2x1x32xf32>
    %58 = vector.shape_cast %4 : vector<1x32xf32> to vector<1x1x32xf32>
    %59 = vector.broadcast %58 : vector<1x1x32xf32> to vector<2x1x32xf32>
    %60 = arith.addf %59, %54 : vector<2x1x32xf32>
    %61 = arith.maximumf %42, %60 : vector<2x1x32xf32>
    %62 = arith.subf %42, %61 : vector<2x1x32xf32>
    %63 = math.exp %62 : vector<2x1x32xf32>
    %64 = arith.subf %60, %61 : vector<2x1x32xf32>
    %65 = math.exp %64 : vector<2x1x32xf32>
    %66 = arith.mulf %63, %49 : vector<2x1x32xf32>
    %67 = arith.mulf %65, %57 : vector<2x1x32xf32>
    %68 = arith.addf %66, %67 : vector<2x1x32xf32>
    %69 = arith.mulf %63, %51 : vector<2x1x32xf32>
    %70 = arith.addf %69, %65 : vector<2x1x32xf32>
    %71 = tpu.reciprocal %70 {approx = true} : vector<2x1x32xf32> -> vector<2x1x32xf32>
    %72 = arith.mulf %68, %71 : vector<2x1x32xf32>
    %c0_32 = arith.constant 0 : index
    %73 = arith.index_cast %c1_i32 : i32 to index
    %c0_33 = arith.constant 0 : index
    %c0_34 = arith.constant 0 : index
    %74 = vector.load %arg5[%c0_32, %73, %c0_33, %c0_34] : memref<2x8x1x32xbf16, #tpu.memory_space<vmem>>, vector<2x1x1x32xbf16>
    %75 = vector.shape_cast %74 : vector<2x1x1x32xbf16> to vector<2x1x32xbf16>
    %76 = arith.extf %75 : vector<2x1x32xbf16> to vector<2x1x32xf32>
    %77 = arith.mulf %76, %72 : vector<2x1x32xf32>
    %78 = arith.truncf %77 : vector<2x1x32xf32> to vector<2x1x32xbf16>
    %c0_35 = arith.constant 0 : index
    %79 = arith.index_cast %c1_i32 : i32 to index
    %c0_36 = arith.constant 0 : index
    %c0_37 = arith.constant 0 : index
    %80 = vector.load %arg8[%c0_35, %79, %c0_36, %c0_37] : memref<2x8x1x32xbf16, #tpu.memory_space<vmem>>, vector<2x1x1x32xbf16>
    %81 = vector.shape_cast %80 : vector<2x1x1x32xbf16> to vector<2x1x32xbf16>
    %82 = vector.shape_cast %78 : vector<2x1x32xbf16> to vector<2x1x1x32xbf16>
    tpu.vector_store %arg8[%c0_35, %79, %c0_36, %c0_37], %82 {strides = array<i32>} : memref<2x8x1x32xbf16, #tpu.memory_space<vmem>>, vector<2x1x1x32xbf16>,
    %83 = vector.shape_cast %3 : vector<1x32xf32> to vector<1x1x32xf32>
    %84 = vector.broadcast %83 : vector<1x1x32xf32> to vector<2x1x32xf32>
    %85 = arith.addf %42, %84 : vector<2x1x32xf32>
    %86 = arith.maximumf %85, %54 : vector<2x1x32xf32>
    %87 = arith.subf %85, %86 : vector<2x1x32xf32>
    %88 = math.exp %87 : vector<2x1x32xf32>
    %89 = arith.subf %54, %86 : vector<2x1x32xf32>
    %90 = math.exp %89 : vector<2x1x32xf32>
    %91 = arith.mulf %88, %49 : vector<2x1x32xf32>
    %92 = arith.mulf %90, %57 : vector<2x1x32xf32>
    %93 = arith.addf %91, %92 : vector<2x1x32xf32>
    %94 = arith.mulf %88, %51 : vector<2x1x32xf32>
    %95 = arith.addf %94, %90 : vector<2x1x32xf32>
    %c2_i32 = arith.constant 2 : i32
    %c0_38 = arith.constant 0 : index
    %96 = arith.index_cast %c2_i32 : i32 to index
    %c0_39 = arith.constant 0 : index
    %c0_40 = arith.constant 0 : index
    %97 = vector.load %arg3[%c0_38, %96, %c0_39, %c0_40] : memref<2x8x1x32xf32, #tpu.memory_space<vmem>>, vector<2x1x1x32xf32>
    %98 = vector.shape_cast %97 : vector<2x1x1x32xf32> to vector<2x1x32xf32>
    %c0_41 = arith.constant 0 : index
    %99 = arith.index_cast %c2_i32 : i32 to index
    %c0_42 = arith.constant 0 : index
    %c0_43 = arith.constant 0 : index
    %100 = vector.load %arg4[%c0_41, %99, %c0_42, %c0_43] : memref<2x8x1x32xf32, #tpu.memory_space<vmem>>, vector<2x1x1x32xf32>
    %101 = vector.shape_cast %100 : vector<2x1x1x32xf32> to vector<2x1x32xf32>
    %102 = vector.shape_cast %4 : vector<1x32xf32> to vector<1x1x32xf32>
    %103 = vector.broadcast %102 : vector<1x1x32xf32> to vector<2x1x32xf32>
    %104 = arith.addf %103, %98 : vector<2x1x32xf32>
    %105 = arith.maximumf %86, %104 : vector<2x1x32xf32>
    %106 = arith.subf %86, %105 : vector<2x1x32xf32>
    %107 = math.exp %106 : vector<2x1x32xf32>
    %108 = arith.subf %104, %105 : vector<2x1x32xf32>
    %109 = math.exp %108 : vector<2x1x32xf32>
    %110 = arith.mulf %107, %93 : vector<2x1x32xf32>
    %111 = arith.mulf %109, %101 : vector<2x1x32xf32>
    %112 = arith.addf %110, %111 : vector<2x1x32xf32>
    %113 = arith.mulf %107, %95 : vector<2x1x32xf32>
    %114 = arith.addf %113, %109 : vector<2x1x32xf32>
    %115 = tpu.reciprocal %114 {approx = true} : vector<2x1x32xf32> -> vector<2x1x32xf32>
    %116 = arith.mulf %112, %115 : vector<2x1x32xf32>
    %c0_44 = arith.constant 0 : index
    %117 = arith.index_cast %c2_i32 : i32 to index
    %c0_45 = arith.constant 0 : index
    %c0_46 = arith.constant 0 : index
    %118 = vector.load %arg5[%c0_44, %117, %c0_45, %c0_46] : memref<2x8x1x32xbf16, #tpu.memory_space<vmem>>, vector<2x1x1x32xbf16>
    %119 = vector.shape_cast %118 : vector<2x1x1x32xbf16> to vector<2x1x32xbf16>
    %120 = arith.extf %119 : vector<2x1x32xbf16> to vector<2x1x32xf32>
    %121 = arith.mulf %120, %116 : vector<2x1x32xf32>
    %122 = arith.truncf %121 : vector<2x1x32xf32> to vector<2x1x32xbf16>
    %c0_47 = arith.constant 0 : index
    %123 = arith.index_cast %c2_i32 : i32 to index
    %c0_48 = arith.constant 0 : index
    %c0_49 = arith.constant 0 : index
    %124 = vector.load %arg8[%c0_47, %123, %c0_48, %c0_49] : memref<2x8x1x32xbf16, #tpu.memory_space<vmem>>, vector<2x1x1x32xbf16>
    %125 = vector.shape_cast %124 : vector<2x1x1x32xbf16> to vector<2x1x32xbf16>
    %126 = vector.shape_cast %122 : vector<2x1x32xbf16> to vector<2x1x1x32xbf16>
    tpu.vector_store %arg8[%c0_47, %123, %c0_48, %c0_49], %126 {strides = array<i32>} : memref<2x8x1x32xbf16, #tpu.memory_space<vmem>>, vector<2x1x1x32xbf16>,
    %127 = vector.shape_cast %3 : vector<1x32xf32> to vector<1x1x32xf32>
    %128 = vector.broadcast %127 : vector<1x1x32xf32> to vector<2x1x32xf32>
    %129 = arith.addf %86, %128 : vector<2x1x32xf32>
    %130 = arith.maximumf %129, %98 : vector<2x1x32xf32>
    %131 = arith.subf %129, %130 : vector<2x1x32xf32>
    %132 = math.exp %131 : vector<2x1x32xf32>
    %133 = arith.subf %98, %130 : vector<2x1x32xf32>
    %134 = math.exp %133 : vector<2x1x32xf32>
    %135 = arith.mulf %132, %93 : vector<2x1x32xf32>
    %136 = arith.mulf %134, %101 : vector<2x1x32xf32>
    %137 = arith.addf %135, %136 : vector<2x1x32xf32>
    %138 = arith.mulf %132, %95 : vector<2x1x32xf32>
    %139 = arith.addf %138, %134 : vector<2x1x32xf32>
    %c3_i32 = arith.constant 3 : i32
    %c0_50 = arith.constant 0 : index
    %140 = arith.index_cast %c3_i32 : i32 to index
    %c0_51 = arith.constant 0 : index
    %c0_52 = arith.constant 0 : index
    %141 = vector.load %arg3[%c0_50, %140, %c0_51, %c0_52] : memref<2x8x1x32xf32, #tpu.memory_space<vmem>>, vector<2x1x1x32xf32>
    %142 = vector.shape_cast %141 : vector<2x1x1x32xf32> to vector<2x1x32xf32>
    %c0_53 = arith.constant 0 : index
    %143 = arith.index_cast %c3_i32 : i32 to index
    %c0_54 = arith.constant 0 : index
    %c0_55 = arith.constant 0 : index
    %144 = vector.load %arg4[%c0_53, %143, %c0_54, %c0_55] : memref<2x8x1x32xf32, #tpu.memory_space<vmem>>, vector<2x1x1x32xf32>
    %145 = vector.shape_cast %144 : vector<2x1x1x32xf32> to vector<2x1x32xf32>
    %146 = vector.shape_cast %4 : vector<1x32xf32> to vector<1x1x32xf32>
    %147 = vector.broadcast %146 : vector<1x1x32xf32> to vector<2x1x32xf32>
    %148 = arith.addf %147, %142 : vector<2x1x32xf32>
    %149 = arith.maximumf %130, %148 : vector<2x1x32xf32>
    %150 = arith.subf %130, %149 : vector<2x1x32xf32>
    %151 = math.exp %150 : vector<2x1x32xf32>
    %152 = arith.subf %148, %149 : vector<2x1x32xf32>
    %153 = math.exp %152 : vector<2x1x32xf32>
    %154 = arith.mulf %151, %137 : vector<2x1x32xf32>
    %155 = arith.mulf %153, %145 : vector<2x1x32xf32>
    %156 = arith.addf %154, %155 : vector<2x1x32xf32>
    %157 = arith.mulf %151, %139 : vector<2x1x32xf32>
    %158 = arith.addf %157, %153 : vector<2x1x32xf32>
    %159 = tpu.reciprocal %158 {approx = true} : vector<2x1x32xf32> -> vector<2x1x32xf32>
    %160 = arith.mulf %156, %159 : vector<2x1x32xf32>
    %c0_56 = arith.constant 0 : index
    %161 = arith.index_cast %c3_i32 : i32 to index
    %c0_57 = arith.constant 0 : index
    %c0_58 = arith.constant 0 : index
    %162 = vector.load %arg5[%c0_56, %161, %c0_57, %c0_58] : memref<2x8x1x32xbf16, #tpu.memory_space<vmem>>, vector<2x1x1x32xbf16>
    %163 = vector.shape_cast %162 : vector<2x1x1x32xbf16> to vector<2x1x32xbf16>
    %164 = arith.extf %163 : vector<2x1x32xbf16> to vector<2x1x32xf32>
    %165 = arith.mulf %164, %160 : vector<2x1x32xf32>
    %166 = arith.truncf %165 : vector<2x1x32xf32> to vector<2x1x32xbf16>
    %c0_59 = arith.constant 0 : index
    %167 = arith.index_cast %c3_i32 : i32 to index
    %c0_60 = arith.constant 0 : index
    %c0_61 = arith.constant 0 : index
    %168 = vector.load %arg8[%c0_59, %167, %c0_60, %c0_61] : memref<2x8x1x32xbf16, #tpu.memory_space<vmem>>, vector<2x1x1x32xbf16>
    %169 = vector.shape_cast %168 : vector<2x1x1x32xbf16> to vector<2x1x32xbf16>
    %170 = vector.shape_cast %166 : vector<2x1x32xbf16> to vector<2x1x1x32xbf16>
    tpu.vector_store %arg8[%c0_59, %167, %c0_60, %c0_61], %170 {strides = array<i32>} : memref<2x8x1x32xbf16, #tpu.memory_space<vmem>>, vector<2x1x1x32xbf16>,
    %171 = vector.shape_cast %3 : vector<1x32xf32> to vector<1x1x32xf32>
    %172 = vector.broadcast %171 : vector<1x1x32xf32> to vector<2x1x32xf32>
    %173 = arith.addf %130, %172 : vector<2x1x32xf32>
    %174 = arith.maximumf %173, %142 : vector<2x1x32xf32>
    %175 = arith.subf %173, %174 : vector<2x1x32xf32>
    %176 = math.exp %175 : vector<2x1x32xf32>
    %177 = arith.subf %142, %174 : vector<2x1x32xf32>
    %178 = math.exp %177 : vector<2x1x32xf32>
    %179 = arith.mulf %176, %137 : vector<2x1x32xf32>
    %180 = arith.mulf %178, %145 : vector<2x1x32xf32>
    %181 = arith.addf %179, %180 : vector<2x1x32xf32>
    %182 = arith.mulf %176, %139 : vector<2x1x32xf32>
    %183 = arith.addf %182, %178 : vector<2x1x32xf32>
    %c4_i32 = arith.constant 4 : i32
    %c0_62 = arith.constant 0 : index
    %184 = arith.index_cast %c4_i32 : i32 to index
    %c0_63 = arith.constant 0 : index
    %c0_64 = arith.constant 0 : index
    %185 = vector.load %arg3[%c0_62, %184, %c0_63, %c0_64] : memref<2x8x1x32xf32, #tpu.memory_space<vmem>>, vector<2x1x1x32xf32>
    %186 = vector.shape_cast %185 : vector<2x1x1x32xf32> to vector<2x1x32xf32>
    %c0_65 = arith.constant 0 : index
    %187 = arith.index_cast %c4_i32 : i32 to index
    %c0_66 = arith.constant 0 : index
    %c0_67 = arith.constant 0 : index
    %188 = vector.load %arg4[%c0_65, %187, %c0_66, %c0_67] : memref<2x8x1x32xf32, #tpu.memory_space<vmem>>, vector<2x1x1x32xf32>
    %189 = vector.shape_cast %188 : vector<2x1x1x32xf32> to vector<2x1x32xf32>
    %190 = vector.shape_cast %4 : vector<1x32xf32> to vector<1x1x32xf32>
    %191 = vector.broadcast %190 : vector<1x1x32xf32> to vector<2x1x32xf32>
    %192 = arith.addf %191, %186 : vector<2x1x32xf32>
    %193 = arith.maximumf %174, %192 : vector<2x1x32xf32>
    %194 = arith.subf %174, %193 : vector<2x1x32xf32>
    %195 = math.exp %194 : vector<2x1x32xf32>
    %196 = arith.subf %192, %193 : vector<2x1x32xf32>
    %197 = math.exp %196 : vector<2x1x32xf32>
    %198 = arith.mulf %195, %181 : vector<2x1x32xf32>
    %199 = arith.mulf %197, %189 : vector<2x1x32xf32>
    %200 = arith.addf %198, %199 : vector<2x1x32xf32>
    %201 = arith.mulf %195, %183 : vector<2x1x32xf32>
    %202 = arith.addf %201, %197 : vector<2x1x32xf32>
    %203 = tpu.reciprocal %202 {approx = true} : vector<2x1x32xf32> -> vector<2x1x32xf32>
    %204 = arith.mulf %200, %203 : vector<2x1x32xf32>
    %c0_68 = arith.constant 0 : index
    %205 = arith.index_cast %c4_i32 : i32 to index
    %c0_69 = arith.constant 0 : index
    %c0_70 = arith.constant 0 : index
    %206 = vector.load %arg5[%c0_68, %205, %c0_69, %c0_70] : memref<2x8x1x32xbf16, #tpu.memory_space<vmem>>, vector<2x1x1x32xbf16>
    %207 = vector.shape_cast %206 : vector<2x1x1x32xbf16> to vector<2x1x32xbf16>
    %208 = arith.extf %207 : vector<2x1x32xbf16> to vector<2x1x32xf32>
    %209 = arith.mulf %208, %204 : vector<2x1x32xf32>
    %210 = arith.truncf %209 : vector<2x1x32xf32> to vector<2x1x32xbf16>
    %c0_71 = arith.constant 0 : index
    %211 = arith.index_cast %c4_i32 : i32 to index
    %c0_72 = arith.constant 0 : index
    %c0_73 = arith.constant 0 : index
    %212 = vector.load %arg8[%c0_71, %211, %c0_72, %c0_73] : memref<2x8x1x32xbf16, #tpu.memory_space<vmem>>, vector<2x1x1x32xbf16>
    %213 = vector.shape_cast %212 : vector<2x1x1x32xbf16> to vector<2x1x32xbf16>
    %214 = vector.shape_cast %210 : vector<2x1x32xbf16> to vector<2x1x1x32xbf16>
    tpu.vector_store %arg8[%c0_71, %211, %c0_72, %c0_73], %214 {strides = array<i32>} : memref<2x8x1x32xbf16, #tpu.memory_space<vmem>>, vector<2x1x1x32xbf16>,
    %215 = vector.shape_cast %3 : vector<1x32xf32> to vector<1x1x32xf32>
    %216 = vector.broadcast %215 : vector<1x1x32xf32> to vector<2x1x32xf32>
    %217 = arith.addf %174, %216 : vector<2x1x32xf32>
    %218 = arith.maximumf %217, %186 : vector<2x1x32xf32>
    %219 = arith.subf %217, %218 : vector<2x1x32xf32>
    %220 = math.exp %219 : vector<2x1x32xf32>
    %221 = arith.subf %186, %218 : vector<2x1x32xf32>
    %222 = math.exp %221 : vector<2x1x32xf32>
    %223 = arith.mulf %220, %181 : vector<2x1x32xf32>
    %224 = arith.mulf %222, %189 : vector<2x1x32xf32>
    %225 = arith.addf %223, %224 : vector<2x1x32xf32>
    %226 = arith.mulf %220, %183 : vector<2x1x32xf32>
    %227 = arith.addf %226, %222 : vector<2x1x32xf32>
    %c5_i32 = arith.constant 5 : i32
    %c0_74 = arith.constant 0 : index
    %228 = arith.index_cast %c5_i32 : i32 to index
    %c0_75 = arith.constant 0 : index
    %c0_76 = arith.constant 0 : index
    %229 = vector.load %arg3[%c0_74, %228, %c0_75, %c0_76] : memref<2x8x1x32xf32, #tpu.memory_space<vmem>>, vector<2x1x1x32xf32>
    %230 = vector.shape_cast %229 : vector<2x1x1x32xf32> to vector<2x1x32xf32>
    %c0_77 = arith.constant 0 : index
    %231 = arith.index_cast %c5_i32 : i32 to index
    %c0_78 = arith.constant 0 : index
    %c0_79 = arith.constant 0 : index
    %232 = vector.load %arg4[%c0_77, %231, %c0_78, %c0_79] : memref<2x8x1x32xf32, #tpu.memory_space<vmem>>, vector<2x1x1x32xf32>
    %233 = vector.shape_cast %232 : vector<2x1x1x32xf32> to vector<2x1x32xf32>
    %234 = vector.shape_cast %4 : vector<1x32xf32> to vector<1x1x32xf32>
    %235 = vector.broadcast %234 : vector<1x1x32xf32> to vector<2x1x32xf32>
    %236 = arith.addf %235, %230 : vector<2x1x32xf32>
    %237 = arith.maximumf %218, %236 : vector<2x1x32xf32>
    %238 = arith.subf %218, %237 : vector<2x1x32xf32>
    %239 = math.exp %238 : vector<2x1x32xf32>
    %240 = arith.subf %236, %237 : vector<2x1x32xf32>
    %241 = math.exp %240 : vector<2x1x32xf32>
    %242 = arith.mulf %239, %225 : vector<2x1x32xf32>
    %243 = arith.mulf %241, %233 : vector<2x1x32xf32>
    %244 = arith.addf %242, %243 : vector<2x1x32xf32>
    %245 = arith.mulf %239, %227 : vector<2x1x32xf32>
    %246 = arith.addf %245, %241 : vector<2x1x32xf32>
    %247 = tpu.reciprocal %246 {approx = true} : vector<2x1x32xf32> -> vector<2x1x32xf32>
    %248 = arith.mulf %244, %247 : vector<2x1x32xf32>
    %c0_80 = arith.constant 0 : index
    %249 = arith.index_cast %c5_i32 : i32 to index
    %c0_81 = arith.constant 0 : index
    %c0_82 = arith.constant 0 : index
    %250 = vector.load %arg5[%c0_80, %249, %c0_81, %c0_82] : memref<2x8x1x32xbf16, #tpu.memory_space<vmem>>, vector<2x1x1x32xbf16>
    %251 = vector.shape_cast %250 : vector<2x1x1x32xbf16> to vector<2x1x32xbf16>
    %252 = arith.extf %251 : vector<2x1x32xbf16> to vector<2x1x32xf32>
    %253 = arith.mulf %252, %248 : vector<2x1x32xf32>
    %254 = arith.truncf %253 : vector<2x1x32xf32> to vector<2x1x32xbf16>
    %c0_83 = arith.constant 0 : index
    %255 = arith.index_cast %c5_i32 : i32 to index
    %c0_84 = arith.constant 0 : index
    %c0_85 = arith.constant 0 : index
    %256 = vector.load %arg8[%c0_83, %255, %c0_84, %c0_85] : memref<2x8x1x32xbf16, #tpu.memory_space<vmem>>, vector<2x1x1x32xbf16>
    %257 = vector.shape_cast %256 : vector<2x1x1x32xbf16> to vector<2x1x32xbf16>
    %258 = vector.shape_cast %254 : vector<2x1x32xbf16> to vector<2x1x1x32xbf16>
    tpu.vector_store %arg8[%c0_83, %255, %c0_84, %c0_85], %258 {strides = array<i32>} : memref<2x8x1x32xbf16, #tpu.memory_space<vmem>>, vector<2x1x1x32xbf16>,
    %259 = vector.shape_cast %3 : vector<1x32xf32> to vector<1x1x32xf32>
    %260 = vector.broadcast %259 : vector<1x1x32xf32> to vector<2x1x32xf32>
    %261 = arith.addf %218, %260 : vector<2x1x32xf32>
    %262 = arith.maximumf %261, %230 : vector<2x1x32xf32>
    %263 = arith.subf %261, %262 : vector<2x1x32xf32>
    %264 = math.exp %263 : vector<2x1x32xf32>
    %265 = arith.subf %230, %262 : vector<2x1x32xf32>
    %266 = math.exp %265 : vector<2x1x32xf32>
    %267 = arith.mulf %264, %225 : vector<2x1x32xf32>
    %268 = arith.mulf %266, %233 : vector<2x1x32xf32>
    %269 = arith.addf %267, %268 : vector<2x1x32xf32>
    %270 = arith.mulf %264, %227 : vector<2x1x32xf32>
    %271 = arith.addf %270, %266 : vector<2x1x32xf32>
    %c6_i32 = arith.constant 6 : i32
    %c0_86 = arith.constant 0 : index
    %272 = arith.index_cast %c6_i32 : i32 to index
    %c0_87 = arith.constant 0 : index
    %c0_88 = arith.constant 0 : index
    %273 = vector.load %arg3[%c0_86, %272, %c0_87, %c0_88] : memref<2x8x1x32xf32, #tpu.memory_space<vmem>>, vector<2x1x1x32xf32>
    %274 = vector.shape_cast %273 : vector<2x1x1x32xf32> to vector<2x1x32xf32>
    %c0_89 = arith.constant 0 : index
    %275 = arith.index_cast %c6_i32 : i32 to index
    %c0_90 = arith.constant 0 : index
    %c0_91 = arith.constant 0 : index
    %276 = vector.load %arg4[%c0_89, %275, %c0_90, %c0_91] : memref<2x8x1x32xf32, #tpu.memory_space<vmem>>, vector<2x1x1x32xf32>
    %277 = vector.shape_cast %276 : vector<2x1x1x32xf32> to vector<2x1x32xf32>
    %278 = vector.shape_cast %4 : vector<1x32xf32> to vector<1x1x32xf32>
    %279 = vector.broadcast %278 : vector<1x1x32xf32> to vector<2x1x32xf32>
    %280 = arith.addf %279, %274 : vector<2x1x32xf32>
    %281 = arith.maximumf %262, %280 : vector<2x1x32xf32>
    %282 = arith.subf %262, %281 : vector<2x1x32xf32>
    %283 = math.exp %282 : vector<2x1x32xf32>
    %284 = arith.subf %280, %281 : vector<2x1x32xf32>
    %285 = math.exp %284 : vector<2x1x32xf32>
    %286 = arith.mulf %283, %269 : vector<2x1x32xf32>
    %287 = arith.mulf %285, %277 : vector<2x1x32xf32>
    %288 = arith.addf %286, %287 : vector<2x1x32xf32>
    %289 = arith.mulf %283, %271 : vector<2x1x32xf32>
    %290 = arith.addf %289, %285 : vector<2x1x32xf32>
    %291 = tpu.reciprocal %290 {approx = true} : vector<2x1x32xf32> -> vector<2x1x32xf32>
    %292 = arith.mulf %288, %291 : vector<2x1x32xf32>
    %c0_92 = arith.constant 0 : index
    %293 = arith.index_cast %c6_i32 : i32 to index
    %c0_93 = arith.constant 0 : index
    %c0_94 = arith.constant 0 : index
    %294 = vector.load %arg5[%c0_92, %293, %c0_93, %c0_94] : memref<2x8x1x32xbf16, #tpu.memory_space<vmem>>, vector<2x1x1x32xbf16>
    %295 = vector.shape_cast %294 : vector<2x1x1x32xbf16> to vector<2x1x32xbf16>
    %296 = arith.extf %295 : vector<2x1x32xbf16> to vector<2x1x32xf32>
    %297 = arith.mulf %296, %292 : vector<2x1x32xf32>
    %298 = arith.truncf %297 : vector<2x1x32xf32> to vector<2x1x32xbf16>
    %c0_95 = arith.constant 0 : index
    %299 = arith.index_cast %c6_i32 : i32 to index
    %c0_96 = arith.constant 0 : index
    %c0_97 = arith.constant 0 : index
    %300 = vector.load %arg8[%c0_95, %299, %c0_96, %c0_97] : memref<2x8x1x32xbf16, #tpu.memory_space<vmem>>, vector<2x1x1x32xbf16>
    %301 = vector.shape_cast %300 : vector<2x1x1x32xbf16> to vector<2x1x32xbf16>
    %302 = vector.shape_cast %298 : vector<2x1x32xbf16> to vector<2x1x1x32xbf16>
    tpu.vector_store %arg8[%c0_95, %299, %c0_96, %c0_97], %302 {strides = array<i32>} : memref<2x8x1x32xbf16, #tpu.memory_space<vmem>>, vector<2x1x1x32xbf16>,
    %303 = vector.shape_cast %3 : vector<1x32xf32> to vector<1x1x32xf32>
    %304 = vector.broadcast %303 : vector<1x1x32xf32> to vector<2x1x32xf32>
    %305 = arith.addf %262, %304 : vector<2x1x32xf32>
    %306 = arith.maximumf %305, %274 : vector<2x1x32xf32>
    %307 = arith.subf %305, %306 : vector<2x1x32xf32>
    %308 = math.exp %307 : vector<2x1x32xf32>
    %309 = arith.subf %274, %306 : vector<2x1x32xf32>
    %310 = math.exp %309 : vector<2x1x32xf32>
    %311 = arith.mulf %308, %269 : vector<2x1x32xf32>
    %312 = arith.mulf %310, %277 : vector<2x1x32xf32>
    %313 = arith.addf %311, %312 : vector<2x1x32xf32>
    %314 = arith.mulf %308, %271 : vector<2x1x32xf32>
    %315 = arith.addf %314, %310 : vector<2x1x32xf32>
    %c7_i32 = arith.constant 7 : i32
    %c0_98 = arith.constant 0 : index
    %316 = arith.index_cast %c7_i32 : i32 to index
    %c0_99 = arith.constant 0 : index
    %c0_100 = arith.constant 0 : index
    %317 = vector.load %arg3[%c0_98, %316, %c0_99, %c0_100] : memref<2x8x1x32xf32, #tpu.memory_space<vmem>>, vector<2x1x1x32xf32>
    %318 = vector.shape_cast %317 : vector<2x1x1x32xf32> to vector<2x1x32xf32>
    %c0_101 = arith.constant 0 : index
    %319 = arith.index_cast %c7_i32 : i32 to index
    %c0_102 = arith.constant 0 : index
    %c0_103 = arith.constant 0 : index
    %320 = vector.load %arg4[%c0_101, %319, %c0_102, %c0_103] : memref<2x8x1x32xf32, #tpu.memory_space<vmem>>, vector<2x1x1x32xf32>
    %321 = vector.shape_cast %320 : vector<2x1x1x32xf32> to vector<2x1x32xf32>
    %322 = vector.shape_cast %4 : vector<1x32xf32> to vector<1x1x32xf32>
    %323 = vector.broadcast %322 : vector<1x1x32xf32> to vector<2x1x32xf32>
    %324 = arith.addf %323, %318 : vector<2x1x32xf32>
    %325 = arith.maximumf %306, %324 : vector<2x1x32xf32>
    %326 = arith.subf %306, %325 : vector<2x1x32xf32>
    %327 = math.exp %326 : vector<2x1x32xf32>
    %328 = arith.subf %324, %325 : vector<2x1x32xf32>
    %329 = math.exp %328 : vector<2x1x32xf32>
    %330 = arith.mulf %327, %313 : vector<2x1x32xf32>
    %331 = arith.mulf %329, %321 : vector<2x1x32xf32>
    %332 = arith.addf %330, %331 : vector<2x1x32xf32>
    %333 = arith.mulf %327, %315 : vector<2x1x32xf32>
    %334 = arith.addf %333, %329 : vector<2x1x32xf32>
    %335 = tpu.reciprocal %334 {approx = true} : vector<2x1x32xf32> -> vector<2x1x32xf32>
    %336 = arith.mulf %332, %335 : vector<2x1x32xf32>
    %c0_104 = arith.constant 0 : index
    %337 = arith.index_cast %c7_i32 : i32 to index
    %c0_105 = arith.constant 0 : index
    %c0_106 = arith.constant 0 : index
    %338 = vector.load %arg5[%c0_104, %337, %c0_105, %c0_106] : memref<2x8x1x32xbf16, #tpu.memory_space<vmem>>, vector<2x1x1x32xbf16>
    %339 = vector.shape_cast %338 : vector<2x1x1x32xbf16> to vector<2x1x32xbf16>
    %340 = arith.extf %339 : vector<2x1x32xbf16> to vector<2x1x32xf32>
    %341 = arith.mulf %340, %336 : vector<2x1x32xf32>
    %342 = arith.truncf %341 : vector<2x1x32xf32> to vector<2x1x32xbf16>
    %c0_107 = arith.constant 0 : index
    %343 = arith.index_cast %c7_i32 : i32 to index
    %c0_108 = arith.constant 0 : index
    %c0_109 = arith.constant 0 : index
    %344 = vector.load %arg8[%c0_107, %343, %c0_108, %c0_109] : memref<2x8x1x32xbf16, #tpu.memory_space<vmem>>, vector<2x1x1x32xbf16>
    %345 = vector.shape_cast %344 : vector<2x1x1x32xbf16> to vector<2x1x32xbf16>
    %346 = vector.shape_cast %342 : vector<2x1x32xbf16> to vector<2x1x1x32xbf16>
    tpu.vector_store %arg8[%c0_107, %343, %c0_108, %c0_109], %346 {strides = array<i32>} : memref<2x8x1x32xbf16, #tpu.memory_space<vmem>>, vector<2x1x1x32xbf16>,
    %347 = vector.shape_cast %3 : vector<1x32xf32> to vector<1x1x32xf32>
    %348 = vector.broadcast %347 : vector<1x1x32xf32> to vector<2x1x32xf32>
    %349 = arith.addf %306, %348 : vector<2x1x32xf32>
    %350 = arith.maximumf %349, %318 : vector<2x1x32xf32>
    %351 = arith.subf %349, %350 : vector<2x1x32xf32>
    %352 = math.exp %351 : vector<2x1x32xf32>
    %353 = arith.subf %318, %350 : vector<2x1x32xf32>
    %354 = math.exp %353 : vector<2x1x32xf32>
    %355 = arith.mulf %352, %313 : vector<2x1x32xf32>
    %356 = arith.mulf %354, %321 : vector<2x1x32xf32>
    %357 = arith.addf %355, %356 : vector<2x1x32xf32>
    %358 = arith.mulf %352, %315 : vector<2x1x32xf32>
    %359 = arith.addf %358, %354 : vector<2x1x32xf32>
    %c8_i32 = arith.constant 8 : i32
    %c0_110 = arith.constant 0 : index
    %c0_111 = arith.constant 0 : index
    %c0_112 = arith.constant 0 : index
    %360 = vector.load %arg9[%c0_110, %c0_111, %c0_112] : memref<2x1x32xf32, #tpu.memory_space<vmem>>, vector<2x1x32xf32>
    tpu.vector_store %arg9[%c0_110, %c0_111, %c0_112], %357 {strides = array<i32>} : memref<2x1x32xf32, #tpu.memory_space<vmem>>, vector<2x1x32xf32>,
    %c0_113 = arith.constant 0 : index
    %c0_114 = arith.constant 0 : index
    %c0_115 = arith.constant 0 : index
    %361 = vector.load %arg10[%c0_113, %c0_114, %c0_115] : memref<2x1x32xf32, #tpu.memory_space<vmem>>, vector<2x1x32xf32>
    tpu.vector_store %arg10[%c0_113, %c0_114, %c0_115], %359 {strides = array<i32>} : memref<2x1x32xf32, #tpu.memory_space<vmem>>, vector<2x1x32xf32>,
    %c0_116 = arith.constant 0 : index
    %c0_117 = arith.constant 0 : index
    %c0_118 = arith.constant 0 : index
    %362 = vector.load %arg11[%c0_116, %c0_117, %c0_118] : memref<2x1x32xf32, #tpu.memory_space<vmem>>, vector<2x1x32xf32>
    tpu.vector_store %arg11[%c0_116, %c0_117, %c0_118], %350 {strides = array<i32>} : memref<2x1x32xf32, #tpu.memory_space<vmem>>, vector<2x1x32xf32>,
    return
  }
  func.func @transform_0(%arg0: i32, %arg1: i32, %arg2: i32) -> (i32, i32, i32, i32) {
    %c0_i32 = arith.constant 0 : i32
    %c0_i32_0 = arith.constant 0 : i32
    return %arg0, %arg2, %arg1, %c0_i32 : i32, i32, i32, i32
  }
  func.func @transform_1(%arg0: i32, %arg1: i32, %arg2: i32) -> (i32, i32, i32, i32) {
    %c0_i32 = arith.constant 0 : i32
    %c0_i32_0 = arith.constant 0 : i32
    return %arg0, %arg2, %arg1, %c0_i32 : i32, i32, i32, i32
  }
  func.func @transform_2(%arg0: i32, %arg1: i32, %arg2: i32) -> (i32, i32, i32, i32) {
    %c0_i32 = arith.constant 0 : i32
    %c0_i32_0 = arith.constant 0 : i32
    return %arg0, %arg2, %arg1, %c0_i32 : i32, i32, i32, i32
  }
  func.func @transform_3(%arg0: i32, %arg1: i32, %arg2: i32) -> (i32, i32) {
    %c0_i32 = arith.constant 0 : i32
    %c0_i32_0 = arith.constant 0 : i32
    return %arg1, %c0_i32 : i32, i32
  }
  func.func @transform_4(%arg0: i32, %arg1: i32, %arg2: i32) -> (i32, i32) {
    %c0_i32 = arith.constant 0 : i32
    %c0_i32_0 = arith.constant 0 : i32
    return %arg1, %c0_i32 : i32, i32
  }
  func.func @transform_5(%arg0: i32, %arg1: i32, %arg2: i32) -> (i32, i32, i32, i32) {
    %c0_i32 = arith.constant 0 : i32
    %c0_i32_0 = arith.constant 0 : i32
    return %arg0, %arg2, %arg1, %c0_i32 : i32, i32, i32, i32
  }
}

</mosaic_0001>

<bundles_post_ra>
// kernel: rwkv_time_mix.5
= control target key start
LH: loop header
LB: loop body
LE: loop exit
PB: predicated region body
PF: predicated region fallthrough
CT: control target
= control target key end

     0   :  { %v164_v1 = vmov 0.0   ;;  %vm165_vm0 = vmmov 0   ;;  %vm17_vm1 = vcmask 261120   ;;  %s212_s0 = inlined_call_operand.vmem [shape: bf16[16,32], index: 0, kind: input, shape index: {}]   ;;  %s213_s1 = inlined_call_operand.vmem [shape: bf16[32,32], index: 1, kind: input, shape index: {}]   ;;  %s214_s2 = inlined_call_operand.hbm [shape: f32[16,32], index: 2, kind: output, shape index: {}]  }
   0x1   :  { %v137_v0 = vld [vmem:[%s213_s1] sm:$0xff]   ;;  %124 = vmatprep.subr.bf16.mxu0 %v164_v1  ;;  %v138_v2 = vld [vmem:[%s213_s1 + $0x8] sm:$0xff]   ;;  %128 = vmatprep.mubr.msk.bf16.mxu0 %vm165_vm0, %v164_v1  ;;  %18 = vst.msk [vmem:[#allocation2] sm:$0xff] %vm17_vm1, %v164_v1  ;;  %19 = vst.msk [vmem:[#allocation2 + $0x8] sm:$0xff] %vm17_vm1, %v164_v1 }
   0x2   :  { %125 = vmatpush3.bf16.msra.mxu0 %v137_v0 }
   0x3   :  { %126 = vmatprep.subr.bf16.mxu0 %v164_v1 }
   0x4   :  { %7 = vsyncpa [#allocation4], 0  ;;  %v139_v3 = vld [vmem:[%s212_s0] sm:$0xff]   ;;  %s166_s1 = smov [#allocation3]  }
   0x5   :  { %s106_s15 = sshll.u32 %s166_s1, 4  ;;  %s107_s15 = int_to_ptr.vmem [resolvable:$true] %s106_s15 }
   0x6   :  { %127 = vmatpush3.bf16.msra.mxu0 %v138_v2  ;;  %s140_s0 = scalar_lea.vmem %s107_s15, 256  ;;  %p145_p1 = scmp.lt.s32.totalorder %s107_s15, %s107_s15 }
   0x7   :  { %p141_p0 = scmp.ne.s32.totalorder %s107_s15, %s140_s0  ;;  %p146_p2 = scmp.lt.s32.totalorder %s140_s0, %s140_s0 }
   0x8   :  { %v20_v4 = vld [vmem:[#allocation2] sm:$0xff]  ;;  %v21_v6 = vld [vmem:[#allocation2 + $0x8] sm:$0xff] }
   0x9   :  { %129 = vmatmul.mubr.msk.bf16.vlgmr.msra.gmra.mrb[0].mxu0 %vm17_vm1, %v139_v3  ;;  %p147_p3 = por %p146_p2, %p145_p1 }
   0xb   :  { %p148_p4 = pnand %p147_p3, %p141_p0 }
  0xdc   :  { %v83_v5 = vpop.f32.mrb[0].mxu0 }
  0xdd   :  { %v90_v7 = vadd.f32 %v83_v5, %v20_v4  ;;  %v130_v8 = vpop.f32.mrb[1].mxu0 }
  0xde   :  { %v86_v9 = vpop.f32.mrb[2].mxu0 }
  0xdf   :  { %92 = vst.msk [vmem:[#allocation2] sm:$0xff] %vm17_vm1, %v90_v7  ;;  %v91_v10 = vadd.f32 %v86_v9, %v21_v6  ;;  %v131_v11 = vpop.f32.mrb[3].mxu0 }
  0xe1   :  { %93 = vst.msk [vmem:[#allocation2 + $0x8] sm:$0xff] %vm17_vm1, %v91_v10 }
  0xe6   :  { %v97_v12 = vld [vmem:[#allocation2] sm:$0xff] }
  0xe7   :  { %99 = vst.msk [vmem:[#allocation3] sm:$0xff] %vm17_vm1, %v97_v12 }
  0xe8   :  { %v98_v13 = vld [vmem:[#allocation2 + $0x8] sm:$0xff] }
  0xe9   :  { %100 = vst.msk [vmem:[#allocation3 + $0x8] sm:$0xff] %vm17_vm1, %v98_v13 }
  0xea   :  { %151 = shalt.err (!%p148_p4)
}
  0xeb   :  { %s152_s18 = scalar_lea.hbm %s214_s2, 256 }
  0xec   :  { %p153_p5 = scmp.ne.s32.totalorder %s214_s2, %s152_s18  ;;  %p156_p6 = scmp.lt.u32.totalorder %s152_s18, %s214_s2 }
  0xee   :  { %p158_p7 = pnand %p156_p6, %p153_p5 }
  0xf0   :  { %161 = shalt.err (!%p158_p7)
}
  0xf1   :  { %s167_s23 = smov 128   ;;  %s168_s24 = smov 8  }
  0xf2   :  { %112 = dma.vmem_to_hbm [thread:$0]  %s107_s15, 256, %s214_s2, [#allocation4], %s167_s23, %s167_s23, %s168_s24  }
  0xf3   :  { %162 = dma.done.wait [#allocation4], 256  }
  0xf4   :  { %163 = vsyncadd [#allocation4], 4294967040 }
  0xf5   :  { %116 = vsyncpa [#allocation4], 1 }

// kernel: rwkv_time_mix.3
= control target key start
LH: loop header
LB: loop body
LE: loop exit
PB: predicated region body
PF: predicated region fallthrough
CT: control target
= control target key end

     0   :  { %vm37_vm0 = vcmask 261120   ;;  %v396_v0 = vmov 0.0   ;;  %vm397_vm1 = vmmov 0   ;;  %vm316_vm2 = vcmask 257024   ;;  %s532_s5 = inlined_call_operand.vmem [shape: bf16[32,32], index: 5, kind: input, shape index: {}]   ;;  %s533_s0 = inlined_call_operand.vmem [shape: f32[16,32], index: 0, kind: input, shape index: {}]   ;;  %s534_s1 = inlined_call_operand.vmem [shape: f32[16,32], index: 1, kind: input, shape index: {}]   ;;  %s535_s2 = inlined_call_operand.vmem [shape: f32[1,32], index: 2, kind: input, shape index: {}]   ;;  %s536_s7 = inlined_call_operand.vmem [shape: bf16[32,32], index: 7, kind: input, shape index: {}]   ;;  %s537_s4 = inlined_call_operand.vmem [shape: f32[1,32], index: 4, kind: input, shape index: {}]   ;;  %s538_s6 = inlined_call_operand.vmem [shape: bf16[32,32], index: 6, kind: input, shape index: {}]   ;;  %s539_s3 = inlined_call_operand.vmem [shape: f32[1,32], index: 3, kind: input, shape index: {}]   ;;  %s540_s8 = inlined_call_operand.vmem [shape: f32[16,32], index: 8, kind: output, shape index: {0}]   ;;  %s541_s9 = inlined_call_operand.vmem [shape: f32[16,32], index: 9, kind: output, shape index: {1}]   ;;  %s542_s10 = inlined_call_operand.vmem [shape: bf16[16,32], index: 10, kind: output, shape index: {2}]  }
   0x1   :  { %356 = vmatprep.subr.bf16.mxu0 %v396_v0  ;;  %v382_v1 = vld [vmem:[%s532_s5] sm:$0xff]   ;;  %360 = vmatprep.mubr.msk.bf16.mxu0 %vm397_vm1, %v396_v0  ;;  %38 = vst.msk [vmem:[#allocation2] sm:$0xff] %vm37_vm0, %v396_v0  ;;  %39 = vst.msk [vmem:[#allocation2 + $0x8] sm:$0xff] %vm37_vm0, %v396_v0  ;;  %v383_v2 = vld [vmem:[%s532_s5 + $0x8] sm:$0xff]  }
   0x2   :  { %40 = vst.msk [vmem:[#allocation3] sm:$0xff] %vm37_vm0, %v396_v0  ;;  %41 = vst.msk [vmem:[#allocation3 + $0x8] sm:$0xff] %vm37_vm0, %v396_v0  ;;  %364 = vmatprep.subr.bf16.mxu1 %v396_v0  ;;  %368 = vmatprep.mubr.msk.bf16.mxu1 %vm397_vm1, %v396_v0  ;;  %v44_v3 = vld [vmem:[%s533_s0] sm:$0xff]  ;;  %v45_v4 = vld [vmem:[%s533_s0 + $0x8] sm:$0xff] }
   0x3   :  { %42 = vst.msk [vmem:[#allocation4] sm:$0xff] %vm37_vm0, %v396_v0  ;;  %43 = vst.msk [vmem:[#allocation4 + $0x8] sm:$0xff] %vm37_vm0, %v396_v0  ;;  %357 = vmatpush3.bf16.msra.mxu0 %v382_v1  ;;  %v46_v5 = vld [vmem:[%s534_s1] sm:$0xff]  ;;  %v47_v6 = vld [vmem:[%s534_s1 + $0x8] sm:$0xff] }
   0x4   :  { %358 = vmatprep.subr.bf16.mxu0 %v396_v0  ;;  %v48_v7 = vsub.f32 %v44_v3, %v46_v5  ;;  %v331_v8 = vld [vmem:[%s535_s2] ss:$0 sm:$0xff]  ;;  %v49_v9 = vsub.f32 %v45_v4, %v47_v6  ;;  %v387_v18 = vld [vmem:[%s538_s6 + $0x8] sm:$0xff]  }
   0x5   :  { %v333_v11 = vld [vmem:[%s537_s4] ss:$0 sm:$0xff]  ;;  %v385_v28 = vld [vmem:[%s536_s7 + $0x8] sm:$0xff]  }
   0x6   :  { %v57_v10 = vmul.f32 %v331_v8, %v48_v7  ;;  %v58_v12 = vmul.f32 %v331_v8, %v49_v9  ;;  %v386_v13 = vld [vmem:[%s538_s6] sm:$0xff]   ;;  %v81_v16 = vmul.f32 %v333_v11, %v48_v7  ;;  %v82_v17 = vmul.f32 %v333_v11, %v49_v9 }
   0x7   :  { %359 = vmatpush3.bf16.msra.mxu0 %v383_v2  ;;  %365 = vmatpush3.bf16.msra.mxu1 %v386_v13  ;;  %v332_v19 = vld [vmem:[%s539_s3] ss:$0 sm:$0xff] }
   0x8   :  { %v59_v14 = vadd.f32 %v57_v10, %v46_v5  ;;  %372 = vmatprep.subr.bf16.mxu0 %v396_v0  ;;  %v60_v15 = vadd.f32 %v58_v12, %v47_v6  ;;  %v384_v20 = vld [vmem:[%s536_s7] sm:$0xff]   ;;  %366 = vmatprep.subr.bf16.mxu1 %v396_v0  ;;  %v69_v21 = vmul.f32 %v332_v19, %v48_v7  ;;  %v87_v33 = vld [vmem:[#allocation2 + $0x8] sm:$0xff] }
   0x9   :  { %v70_v22 = vmul.f32 %v332_v19, %v49_v9  ;;  %v83_v26 = vadd.f32 %v81_v16, %v46_v5  ;;  %v84_v27 = vadd.f32 %v82_v17, %v47_v6  ;;  %v86_v31 = vld [vmem:[#allocation2] sm:$0xff]  ;;  %v153_v36 = vld [vmem:[#allocation3] sm:$0xff]  ;;  %v154_v41 = vld [vmem:[#allocation3 + $0x8] sm:$0xff] }
   0xa   :  { %v61_v23 = vpack.c.bf16 %v60_v15, %v59_v14  ;;  %v71_v24 = vadd.f32 %v69_v21, %v46_v5  ;;  %v219_v45 = vld [vmem:[#allocation4] sm:$0xff]  ;;  %v220_v49 = vld [vmem:[#allocation4 + $0x8] sm:$0xff] }
   0xb   :  { %v72_v25 = vadd.f32 %v70_v22, %v47_v6  ;;  %367 = vmatpush3.bf16.msra.mxu1 %v387_v18  ;;  %v85_v30 = vpack.c.bf16 %v84_v27, %v83_v26 }
   0xc   :  { %361 = vmatmul.mubr.msk.bf16.vlgmr.msra.gmra.mrb[0].mxu0 %vm37_vm0, %v61_v23 }
   0xd   :  { %373 = vmatpush3.bf16.msra.mxu0 %v384_v20  ;;  %376 = vmatprep.mubr.msk.bf16.mxu0 %vm397_vm1, %v396_v0  ;;  %v73_v29 = vpack.c.bf16 %v72_v25, %v71_v24 }
   0xe   :  { %374 = vmatprep.subr.bf16.mxu0 %v396_v0 }
   0xf   :  { %369 = vmatmul.mubr.msk.bf16.vlgmr.msra.gmra.mrb[0].mxu1 %vm37_vm0, %v73_v29 }
  0x11   :  { %375 = vmatpush3.bf16.msra.mxu0 %v385_v28 }
  0x14   :  { %377 = vmatmul.mubr.msk.bf16.vlgmr.msra.gmra.mrb[4].mxu0 %vm37_vm0, %v85_v30 }
  0xdf   :  { %v142_v32 = vpop.f32.mrb[0].mxu0 }
  0xe0   :  { %v149_v34 = vadd.f32 %v142_v32, %v86_v31  ;;  %v362_v35 = vpop.f32.mrb[1].mxu0 }
  0xe1   :  { %v145_v37 = vpop.f32.mrb[2].mxu0 }
  0xe2   :  { %151 = vst.msk [vmem:[#allocation2] sm:$0xff] %vm37_vm0, %v149_v34  ;;  %v150_v38 = vadd.f32 %v145_v37, %v87_v33  ;;  %v363_v39 = vpop.f32.mrb[3].mxu0  ;;  %v208_v40 = vpop.f32.mrb[0].mxu1 }
  0xe3   :  { %v215_v42 = vadd.f32 %v208_v40, %v153_v36  ;;  %v370_v43 = vpop.f32.mrb[1].mxu1 }
  0xe4   :  { %152 = vst.msk [vmem:[#allocation2 + $0x8] sm:$0xff] %vm37_vm0, %v150_v38  ;;  %v211_v44 = vpop.f32.mrb[2].mxu1 }
  0xe5   :  { %217 = vst.msk [vmem:[#allocation3] sm:$0xff] %vm37_vm0, %v215_v42  ;;  %v216_v46 = vadd.f32 %v211_v44, %v154_v41  ;;  %v371_v47 = vpop.f32.mrb[3].mxu1 }
  0xe7   :  { %v274_v48 = vpop.f32.mrb[4].mxu0  ;;  %218 = vst.msk [vmem:[#allocation3 + $0x8] sm:$0xff] %vm37_vm0, %v216_v46 }
  0xe8   :  { %v281_v50 = vadd.f32 %v274_v48, %v219_v45  ;;  %v378_v51 = vpop.f32.mrb[5].mxu0 }
  0xe9   :  { %v288_v52 = vld [vmem:[#allocation2] sm:$0xff]  ;;  %v277_v53 = vpop.f32.mrb[6].mxu0 }
  0xea   :  { %290 = vst.msk [vmem:[%s540_s8] sm:$0xff] %vm37_vm0, %v288_v52  ;;  %283 = vst.msk [vmem:[#allocation4] sm:$0xff] %vm37_vm0, %v281_v50  ;;  %v282_v54 = vadd.f32 %v277_v53, %v220_v49  ;;  %v379_v55 = vpop.f32.mrb[7].mxu0 }
  0xeb   :  { %v289_v56 = vld [vmem:[#allocation2 + $0x8] sm:$0xff] }
  0xec   :  { %291 = vst.msk [vmem:[%s540_s8 + $0x8] sm:$0xff] %vm37_vm0, %v289_v56  ;;  %284 = vst.msk [vmem:[#allocation4 + $0x8] sm:$0xff] %vm37_vm0, %v282_v54  ;;  %v292_v57 = vld [vmem:[#allocation3] sm:$0xff] }
  0xed   :  { %294 = vst.msk [vmem:[%s541_s9] sm:$0xff] %vm37_vm0, %v292_v57 }
  0xee   :  { %v293_v58 = vld [vmem:[#allocation3 + $0x8] sm:$0xff] }
  0xef   :  { %295 = vst.msk [vmem:[%s541_s9 + $0x8] sm:$0xff] %vm37_vm0, %v293_v58 }
  0xf1   :  { %v296_v59 = vld [vmem:[#allocation4] sm:$0xff] }
  0xf2   :  { %v298_v60 = vsub.f32 0.0, %v296_v59 }
  0xf3   :  { %v297_v61 = vld [vmem:[#allocation4 + $0x8] sm:$0xff] }
  0xf4   :  { %v300_v62 = vmul.f32 1.442695, %v298_v60  ;;  %v299_v63 = vsub.f32 0.0, %v297_v61 }
  0xf6   :  { %388 = vpow2.f32 %v300_v62  ;;  %v302_v0 = vmul.f32 1.442695, %v299_v63 }
  0xf8   :  { %390 = vpow2.f32 %v302_v0 }
 0x100   :  { %v389_v1 = vpop.eup %388 }
 0x101   :  { %v304_v2 = vadd.f32 1.0, %v389_v1 }
 0x102   :  { %v391_v3 = vpop.eup %390 }
 0x103   :  { %392 = vrcp.f32 %v304_v2  ;;  %v305_v4 = vadd.f32 1.0, %v391_v3 }
 0x105   :  { %394 = vrcp.f32 %v305_v4 }
 0x10d   :  { %v393_v5 = vpop.eup %392 }
 0x10e   :  { %v345_v6 = vpack.c.bf16 %v393_v5, %v393_v5 }
 0x10f   :  { %v395_v7 = vpop.eup %394 }
 0x110   :  { %317 = vst.msk [vmem:[%s542_s10] sm:$0xf] %vm316_vm2, %v345_v6  ;;  %v346_v8 = vpack.c.bf16 %v395_v7, %v395_v7 }
 0x112   :  { %318 = vst.msk [vmem:[%s542_s10 + $0x4] sm:$0xf] %vm316_vm2, %v346_v8 }

// kernel: rwkv_time_mix.4
= control target key start
LH: loop header
LB: loop body
LE: loop exit
PB: predicated region body
PF: predicated region fallthrough
CT: control target
= control target key end

     0   :  { %vm24_vm0 = vcmask 253952   ;;  %v905_v0 = vmov -1e+38   ;;  %v906_v1 = vmov 0.0   ;;  %vm82_vm1 = vsmask.f32 256  ;;  %s1809_s0 = inlined_call_operand.vmem [shape: f32[2,8,1,32], index: 0, kind: input, shape index: {}]   ;;  %s1810_s4 = inlined_call_operand.vmem [shape: f32[1,32], index: 4, kind: input, shape index: {}]   ;;  %s1811_s3 = inlined_call_operand.vmem [shape: f32[1,32], index: 3, kind: input, shape index: {}]   ;;  %s1812_s2 = inlined_call_operand.vmem [shape: bf16[2,8,1,32], index: 2, kind: input, shape index: {}]   ;;  %s1813_s1 = inlined_call_operand.vmem [shape: f32[2,8,1,32], index: 1, kind: input, shape index: {}]   ;;  %s1814_s5 = inlined_call_operand.vmem [shape: bf16[2,8,1,32], index: 5, kind: output, shape index: {}]  }
   0x1   :  { %29 = vst.msk [vmem:[#allocation4] sm:$0x1] %vm24_vm0, %v905_v0  ;;  %30 = vst.msk [vmem:[#allocation4 + $0x1] sm:$0x1] %vm24_vm0, %v905_v0  ;;  %v946_v2 = vld [vmem:[%s1810_s4] sm:$0x1] }
   0x2   :  { %25 = vst.msk [vmem:[#allocation2] sm:$0x1] %vm24_vm0, %v906_v1  ;;  %26 = vst.msk [vmem:[#allocation2 + $0x1] sm:$0x1] %vm24_vm0, %v906_v1  ;;  %v39_v3 = vld [vmem:[%s1809_s0] sm:$0x1] }
   0x3   :  { %27 = vst.msk [vmem:[#allocation3] sm:$0x1] %vm24_vm0, %v906_v1  ;;  %28 = vst.msk [vmem:[#allocation3 + $0x1] sm:$0x1] %vm24_vm0, %v906_v1  ;;  %v954_v4 = vld [vmem:[%s1809_s0 + $0x3] sm:$0x1]  ;;  %v43_v11 = vadd.f32 %v39_v3, %v946_v2 }
   0x4   :  { %v959_v5 = vld [vmem:[%s1809_s0 + $0x4] sm:$0x1]  ;;  %v964_v6 = vld [vmem:[%s1809_s0 + $0x5] sm:$0x1]  ;;  %v968_v7 = vadd.f32 %v954_v4, %v946_v2  ;;  %v40_v8 = vld [vmem:[%s1809_s0 + $0x8] sm:$0x1] }
   0x5   :  { %1841 = vst [vmem:[#allocation5_spill] sm:$0xff] %v959_v5  ;;  %1842 = vst [vmem:[#allocation6_spill] sm:$0xff] %v964_v6  ;;  %v975_v9 = vadd.f32 %v964_v6, %v946_v2  ;;  %v979_v10 = vadd.f32 %v959_v5, %v946_v2  ;;  %v985_v12 = vld [vmem:[%s1809_s0 + $0xb] sm:$0x1]  ;;  %v990_v13 = vld [vmem:[%s1811_s3] sm:$0x1]  ;;  %v44_v15 = vadd.f32 %v40_v8, %v946_v2 }
   0x6   :  { %1843 = vst [vmem:[#allocation7_spill] sm:$0xff] %v968_v7  ;;  %v995_v14 = vld [vmem:[%s1809_s0 + $0x1] sm:$0x1]  ;;  %v1000_v16 = vadd.f32 %v985_v12, %v946_v2  ;;  %v1005_v17 = vld [vmem:[%s1809_s0 + $0x2] sm:$0x1]  ;;  %vm1268_vm2 = vmand %vm24_vm0, %vm82_vm1 }
   0x7   :  { %1844 = vst [vmem:[#allocation8_spill] sm:$0xff] %v975_v9  ;;  %1845 = vst [vmem:[#allocation9_spill] sm:$0xff] %v979_v10  ;;  %v1010_v18 = vld [vmem:[%s1809_s0 + $0x6] sm:$0x1]  ;;  %v1015_v20 = vld [vmem:[%s1809_s0 + $0x7] sm:$0x1]  ;;  %v1020_v23 = vadd.f32 %v995_v14, %v946_v2  ;;  %v1034_v29 = vadd.f32 %v1005_v17, %v946_v2 }
   0x8   :  { %1846 = vst [vmem:[#allocation10_spill] sm:$0xff] %v1000_v16  ;;  %v37_v19 = vld [vmem:[#allocation4] sm:$0x1]  ;;  %v38_v24 = vld [vmem:[#allocation4 + $0x1] sm:$0x1]  ;;  %v1029_v26 = vadd.f32 %v1010_v18, %v946_v2  ;;  %v1038_v33 = vadd.f32 %v1015_v20, %v946_v2 }
   0x9   :  { %v45_v21 = vmax.f32 %v37_v19, %v43_v11  ;;  %v90_v22 = vadd.f32 %v37_v19, %v990_v13  ;;  %v1025_v25 = vld [vmem:[%s1809_s0 + $0x9] sm:$0x1]  ;;  %v46_v27 = vmax.f32 %v38_v24, %v44_v15  ;;  %v91_v28 = vadd.f32 %v38_v24, %v990_v13  ;;  %v1043_v34 = vld [vmem:[%s1809_s0 + $0xa] sm:$0x1]  ;;  %v1063_v56 = vld [vmem:[%s1809_s0 + $0xc] sm:$0x1] }
   0xa   :  { %v1047_v38 = vadd.f32 %v1025_v25, %v946_v2  ;;  %v1053_v46 = vadd.f32 %v1043_v34, %v946_v2  ;;  %1847 = vst [vmem:[#allocation11_spill] sm:$0xff] %v1063_v56  ;;  %v1073_v60 = vld [vmem:[%s1809_s0 + $0xe] sm:$0x1]  ;;  %v1078_v61 = vld [vmem:[%s1809_s0 + $0xf] sm:$0x1] }
   0xb   :  { %v47_v30 = vsub.f32 %v37_v19, %v45_v21  ;;  %v53_v31 = vsub.f32 %v43_v11, %v45_v21  ;;  %v92_v32 = vmax.f32 %v90_v22, %v39_v3  ;;  %v48_v35 = vsub.f32 %v38_v24, %v46_v27  ;;  %1848 = vst [vmem:[#allocation12_spill] sm:$0xff] %v1073_v60  ;;  %v1088_v11 = vld [vmem:[%s1809_s0 + $0xd] sm:$0x1] }
   0xc   :  { %v54_v36 = vsub.f32 %v44_v15, %v46_v27  ;;  %v93_v37 = vmax.f32 %v91_v28, %v40_v8  ;;  %1849 = vst [vmem:[#allocation13_spill] sm:$0xff] %v1088_v11  ;;  %v1092_v15 = vadd.f32 %v1073_v60, %v946_v2  ;;  %v1096_v19 = vadd.f32 %v1078_v61, %v946_v2  ;;  %v1113_v27 = vld [vmem:[%s1812_s2] sm:$0x1] }
   0xd   :  { %v49_v39 = vmul.f32 1.442695, %v47_v30  ;;  %v55_v40 = vmul.f32 1.442695, %v53_v31  ;;  %v94_v41 = vsub.f32 %v90_v22, %v92_v32  ;;  %v100_v42 = vsub.f32 %v39_v3, %v92_v32  ;;  %v1123_v30 = vld [vmem:[%s1812_s2 + $0x1] sm:$0x1] }
   0xe   :  { %v124_v43 = vmax.f32 %v92_v32, %v1020_v23  ;;  %v168_v44 = vadd.f32 %v92_v32, %v990_v13  ;;  %v51_v45 = vmul.f32 1.442695, %v48_v35  ;;  %v95_v49 = vsub.f32 %v91_v28, %v93_v37  ;;  %1850 = vst [vmem:[#allocation14_spill] sm:$0xff] %v1092_v15  ;;  %v1118_v28 = vld [vmem:[%s1812_s2 + $0x8] sm:$0x1] }
   0xf   :  { %745 = vpow2.f32 %v49_v39  ;;  %v96_v47 = vmul.f32 1.442695, %v94_v41  ;;  %v102_v48 = vmul.f32 1.442695, %v100_v42  ;;  %v57_v52 = vmul.f32 1.442695, %v54_v36 }
  0x10   :  { %747 = vpow2.f32 %v55_v40  ;;  %v126_v50 = vsub.f32 %v92_v32, %v124_v43  ;;  %v1056_v51 = vmax.f32 %v168_v44, %v995_v14  ;;  %v132_v53 = vsub.f32 %v1020_v23, %v124_v43  ;;  %v35_v31 = vld [vmem:[#allocation3] sm:$0x1]  ;;  %v34_v42 = vld [vmem:[#allocation2 + $0x1] sm:$0x1] }
  0x11   :  { %749 = vpow2.f32 %v96_v47  ;;  %v101_v54 = vsub.f32 %v40_v8, %v93_v37  ;;  %v125_v55 = vmax.f32 %v93_v37, %v1047_v38  ;;  %v98_v62 = vmul.f32 1.442695, %v95_v49 }
  0x12   :  { %751 = vpow2.f32 %v102_v48  ;;  %v128_v57 = vmul.f32 1.442695, %v126_v50  ;;  %v172_v58 = vsub.f32 %v168_v44, %v1056_v51  ;;  %v1068_v59 = vadd.f32 %v1056_v51, %v990_v13 }
  0x13   :  { %753 = vpow2.f32 %v51_v45  ;;  %v104_v63 = vmul.f32 1.442695, %v101_v54  ;;  %v127_v0 = vsub.f32 %v93_v37, %v125_v55  ;;  %v169_v8 = vadd.f32 %v93_v37, %v990_v13 }
  0x14   :  { %755 = vpow2.f32 %v128_v57  ;;  %v174_v1 = vmul.f32 1.442695, %v172_v58  ;;  %v1082_v3 = vmax.f32 %v1068_v59, %v1005_v17  ;;  %v1100_v21 = vadd.f32 %v1063_v56, %v946_v2 }
  0x15   :  { %757 = vpow2.f32 %v57_v52  ;;  %v133_v23 = vsub.f32 %v1047_v38, %v125_v55  ;;  %v1108_v24 = vmax.f32 %v169_v8, %v1025_v25  ;;  %v130_v32 = vmul.f32 1.442695, %v127_v0  ;;  %v36_v52 = vld [vmem:[#allocation3 + $0x1] sm:$0x1]  ;;  %v1169_v0 = vld [vmem:[%s1812_s2 + $0x9] sm:$0x1] }
  0x16   :  { %1851 = vst [vmem:[#allocation15_spill] sm:$0xff] %v1100_v21  ;;  %759 = vpow2.f32 %v174_v1  ;;  %v1104_v22 = vadd.f32 %v1082_v3, %v990_v13  ;;  %v134_v35 = vmul.f32 1.442695, %v132_v53  ;;  %v178_v36 = vsub.f32 %v995_v14, %v1056_v51  ;;  %1853 = vst [vmem:[#allocation17_spill] sm:$0xff] %v1169_v0 }
  0x17   :  { %761 = vpow2.f32 %v98_v62  ;;  %v173_v38 = vsub.f32 %v169_v8, %v1108_v24  ;;  %v1134_v39 = vadd.f32 %v1108_v24, %v990_v13  ;;  %v1141_v14 = vadd.f32 %v1088_v11, %v946_v2  ;;  %v33_v8 = vld [vmem:[#allocation2] sm:$0x1] }
  0x18   :  { %v1129_v37 = vmax.f32 %v1104_v22, %v954_v4  ;;  %763 = vpow2.f32 %v104_v63  ;;  %v180_v53 = vmul.f32 1.442695, %v178_v36  ;;  %v136_v54 = vmul.f32 1.442695, %v133_v23  ;;  %v41_v63 = vld [vmem:[%s1813_s1] sm:$0x1] }
  0x19   :  { %v746_v40 = vpop.eup %745  ;;  %1852 = vst [vmem:[#allocation16_spill] sm:$0xff] %v1141_v14  ;;  %v176_v48 = vmul.f32 1.442695, %v173_v38  ;;  %v1149_v49 = vmax.f32 %v1134_v39, %v1043_v34  ;;  %765 = vpow2.f32 %v130_v32  ;;  %v1153_v2 = vmax.f32 %v1056_v51, %v1034_v29 }
  0x1a   :  { %v748_v44 = vpop.eup %747  ;;  %v65_v45 = vmul.f32 %v746_v40, %v35_v31  ;;  %v1145_v47 = vadd.f32 %v1129_v37, %v990_v13  ;;  %767 = vpow2.f32 %v134_v35  ;;  %v179_v32 = vsub.f32 %v1025_v25, %v1108_v24 }
  0x1b   :  { %v750_v50 = vpop.eup %749  ;;  %v1161_v62 = vadd.f32 %v1149_v49, %v990_v13  ;;  %769 = vpow2.f32 %v176_v48  ;;  %v204_v25 = vsub.f32 %v1056_v51, %v1153_v2  ;;  %v61_v51 = vmul.f32 %v748_v44, %v41_v63 }
  0x1c   :  { %v752_v55 = vpop.eup %751  ;;  %v112_v57 = vmul.f32 %v750_v50, %v35_v31  ;;  %v1157_v58 = vmax.f32 %v1145_v47, %v959_v5  ;;  %v67_v23 = vadd.f32 %v748_v44, %v65_v45  ;;  %v106_v41 = vmul.f32 %v750_v50, %v33_v8  ;;  %v42_v50 = vld [vmem:[%s1813_s1 + $0x8] sm:$0x1] }
  0x1d   :  { %v754_v1 = vpop.eup %753  ;;  %v108_v31 = vmul.f32 %v752_v55, %v41_v63  ;;  %v1179_v35 = vmax.f32 %v1161_v62, %v985_v12  ;;  %v59_v45 = vmul.f32 %v746_v40, %v33_v8  ;;  %v182_v9 = vmul.f32 1.442695, %v179_v32 }
  0x1e   :  { %v756_v36 = vpop.eup %755  ;;  %v1175_v38 = vadd.f32 %v1157_v58, %v990_v13  ;;  %v66_v43 = vmul.f32 %v754_v1, %v36_v52  ;;  %v114_v48 = vadd.f32 %v752_v55, %v112_v57  ;;  %771 = vrcp.f32 %v67_v23 }
  0x1f   :  { %v758_v21 = vpop.eup %757  ;;  %v1190_v7 = vadd.f32 %v1179_v35, %v990_v13  ;;  %v210_v57 = vsub.f32 %v1034_v29, %v1153_v2  ;;  %v60_v14 = vmul.f32 %v754_v1, %v34_v42  ;;  %v110_v0 = vadd.f32 %v108_v31, %v106_v41 }
  0x20   :  { %1854 = vst [vmem:[#allocation18_spill] sm:$0xff] %v1175_v38  ;;  %v760_v10 = vpop.eup %759  ;;  %v1186_v16 = vmax.f32 %v1175_v38, %v964_v6  ;;  %v68_v55 = vadd.f32 %v758_v21, %v66_v43  ;;  %773 = vpow2.f32 %v180_v53  ;;  %v62_v5 = vmul.f32 %v758_v21, %v42_v50 }
  0x21   :  { %1855 = vst [vmem:[#allocation19_spill] sm:$0xff] %v1190_v7  ;;  %v762_v23 = vpop.eup %761  ;;  %v1203_v38 = vmax.f32 %v1190_v7, %v1063_v56  ;;  %v144_v29 = vmul.f32 %v756_v36, %v114_v48  ;;  %v1213_v8 = vmul.f32 %v760_v10, %v114_v48  ;;  %v63_v41 = vadd.f32 %v61_v51, %v59_v45 }
  0x22   :  { %v764_v15 = vpop.eup %763  ;;  %v1199_v6 = vadd.f32 %v1186_v16, %v990_v13  ;;  %v113_v43 = vmul.f32 %v762_v23, %v36_v52  ;;  %775 = vrcp.f32 %v68_v55  ;;  %v107_v63 = vmul.f32 %v762_v23, %v34_v42 }
  0x23   :  { %v1211_v44 = vadd.f32 %v1203_v38, %v990_v13  ;;  %v109_v2 = vmul.f32 %v764_v15, %v42_v50  ;;  %v766_v1 = vpop.eup %765  ;;  %777 = vpow2.f32 %v136_v54  ;;  %v1215_v52 = vmul.f32 1.442695, %v204_v25 }
  0x24   :  { %v1207_v40 = vmax.f32 %v1199_v6, %v1010_v18  ;;  %v768_v21 = vpop.eup %767  ;;  %v138_v50 = vmul.f32 %v756_v36, %v110_v0  ;;  %v1229_v48 = vmax.f32 %v1186_v16, %v1029_v26  ;;  %v115_v54 = vadd.f32 %v764_v15, %v113_v43 }
  0x25   :  { %1856 = vst [vmem:[#allocation20_spill] sm:$0xff] %v1211_v44  ;;  %v1223_v32 = vmax.f32 %v1211_v44, %v1088_v11  ;;  %v1225_v42 = vpop.eup %769  ;;  %v64_v45 = vadd.f32 %v62_v5, %v60_v14  ;;  %v146_v25 = vadd.f32 %v768_v21, %v144_v29  ;;  %v675_v11 = vld [vmem:[%s1813_s1 + $0x1] sm:$0x1]  ;;  %v1237_v36 = vadd.f32 %v109_v2, %v107_v63 }
  0x26   :  { %v592_v53 = vmax.f32 %v1207_v40, %v1038_v33  ;;  %v636_v31 = vadd.f32 %v1207_v40, %v990_v13  ;;  %v1243_v5 = vmul.f32 %v760_v10, %v110_v0  ;;  %v1245_v15 = vmul.f32 1.442695, %v210_v57 }
  0x27   :  { %v1241_v56 = vadd.f32 %v1223_v32, %v990_v13  ;;  %779 = vrcp.f32 %v146_v25  ;;  %v1250_v2 = vmul.f32 %v1225_v42, %v115_v54  ;;  %v140_v25 = vmul.f32 %v768_v21, %v675_v11 }
  0x28   :  { %v594_v55 = vsub.f32 %v1207_v40, %v592_v53  ;;  %v600_v23 = vsub.f32 %v1038_v33, %v592_v53  ;;  %v638_v51 = vmax.f32 %v636_v31, %v1015_v20  ;;  %v772_v44 = vpop.eup %771  ;;  %v145_v7 = vmul.f32 %v766_v1, %v115_v54 }
  0x29   :  { %v1254_v63 = vmax.f32 %v1241_v56, %v1073_v60  ;;  %v71_v53 = vmul.f32 %v772_v44, %v63_v41  ;;  %781 = vpow2.f32 %v182_v9  ;;  %v142_v44 = vadd.f32 %v140_v25, %v138_v50  ;;  %v87_v25 = vld [vmem:[%s1814_s5 + $0x8] sm:$0x1] }
  0x2a   :  { %v596_v14 = vmul.f32 1.442695, %v594_v55  ;;  %v602_v33 = vmul.f32 1.442695, %v600_v23  ;;  %v640_v43 = vsub.f32 %v636_v31, %v638_v51  ;;  %v646_v29 = vsub.f32 %v1015_v20, %v638_v51  ;;  %667 = vst.msk [vmem:[#allocation4] sm:$0x1] %vm24_vm0, %v638_v51  ;;  %v774_v10 = vpop.eup %773 }
  0x2b   :  { %v593_v20 = vmax.f32 %v1254_v63, %v1096_v19  ;;  %v637_v31 = vadd.f32 %v1254_v63, %v990_v13  ;;  %v1857_v23 = vunpack.c.l.bf16 %v1113_v27  ;;  %v139_v41 = vmul.f32 %v766_v1, %v1237_v36  ;;  %v84_v27 = vld [vmem:[%s1814_s5] sm:$0x1] }
  0x2c   :  { %v642_v0 = vmul.f32 1.442695, %v640_v43  ;;  %v648_v57 = vmul.f32 1.442695, %v646_v29  ;;  %v776_v55 = vpop.eup %775  ;;  %783 = vpow2.f32 %v596_v14  ;;  %v1860_v50 = vunpack.c.l.bf16 %v1118_v28 }
  0x2d   :  { %v77_v51 = vmul.f32 %v1857_v23, %v71_v53  ;;  %785 = vpow2.f32 %v602_v33  ;;  %v72_v60 = vmul.f32 %v776_v55, %v64_v45  ;;  %v778_v21 = vpop.eup %777  ;;  %v595_v9 = vsub.f32 %v1254_v63, %v593_v20 }
  0x2e   :  { %787 = vpow2.f32 %v642_v0  ;;  %v601_v54 = vsub.f32 %v1096_v19, %v593_v20  ;;  %v639_v14 = vmax.f32 %v637_v31, %v1078_v61  ;;  %v147_v33 = vadd.f32 %v778_v21, %v145_v7 }
  0x2f   :  { %789 = vpow2.f32 %v648_v57  ;;  %v79_v1 = vpack.c.bf16 %v77_v51, %v77_v51  ;;  %v78_v45 = vmul.f32 %v1860_v50, %v72_v60  ;;  %v598_v43 = vmul.f32 1.442695, %v595_v9  ;;  %v679_v50 = vld [vmem:[%s1814_s5 + $0x1] sm:$0x1] }
  0x30   :  { %v604_v19 = vmul.f32 1.442695, %v601_v54  ;;  %v641_v29 = vsub.f32 %v637_v31, %v639_v14  ;;  %v647_v53 = vsub.f32 %v1078_v61, %v639_v14  ;;  %668 = vst.msk [vmem:[#allocation4 + $0x1] sm:$0x1] %vm24_vm0, %v639_v14  ;;  %v186_v55 = vmul.f32 %v774_v10, %v675_v11  ;;  %v676_v11 = vld [vmem:[%s1813_s1 + $0x9] sm:$0x1] }
  0x31   :  { %v85_v0 = vsel %vm1268_vm2, %v79_v1, %v84_v27  ;;  %v80_v57 = vpack.c.bf16 %v78_v45, %v78_v45  ;;  %791 = vrcp.f32 %v147_v33  ;;  %v780_v28 = vpop.eup %779  ;;  %v250_v61 = vsub.f32 %v1068_v59, %v1082_v3 }
  0x32   :  { %793 = vpow2.f32 %v598_v43  ;;  %v644_v7 = vmul.f32 1.442695, %v641_v29  ;;  %v650_v60 = vmul.f32 1.442695, %v647_v53  ;;  %86 = vst [vmem:[%s1814_s5] sm:$0x1] %v85_v0  ;;  %v150_v31 = vmul.f32 %v780_v28, %v142_v44 }
  0x33   :  { %795 = vpow2.f32 %v604_v19  ;;  %v88_v20 = vsel %vm1268_vm2, %v80_v57, %v87_v25  ;;  %v256_v23 = vsub.f32 %v1005_v17, %v1082_v3  ;;  %v252_v51 = vmul.f32 1.442695, %v250_v61  ;;  %v1303_v44 = vpop.eup %781 }
  0x34   :  { %797 = vpow2.f32 %v644_v7  ;;  %89 = vst [vmem:[%s1814_s5 + $0x8] sm:$0x1] %v88_v20  ;;  %v328_v59 = vsub.f32 %v1104_v22, %v1129_v37  ;;  %v334_v9 = vsub.f32 %v954_v4, %v1129_v37  ;;  %v1861_v54 = vunpack.c.l.bf16 %v1123_v30  ;;  %v1862_v20 = vld [vmem:[#allocation5_spill] sm:$0xff] }
  0x35   :  { %799 = vpow2.f32 %v650_v60  ;;  %v1308_v17 = vadd.f32 %v186_v55, %v1243_v5  ;;  %v258_v27 = vmul.f32 1.442695, %v256_v23  ;;  %v141_v22 = vmul.f32 %v778_v21, %v676_v11  ;;  %v1863_v23 = vld [vmem:[#allocation17_spill] sm:$0xff] }
  0x36   :  { %v157_v14 = vmul.f32 %v1861_v54, %v150_v31  ;;  %v1310_v1 = vpop.eup %783  ;;  %v1316_v45 = vadd.f32 %v774_v10, %v1213_v8  ;;  %801 = vpow2.f32 %v1215_v52  ;;  %v330_v4 = vmul.f32 1.442695, %v328_v59  ;;  %v1865_v59 = vld [vmem:[#allocation18_spill] sm:$0xff] }
  0x37   :  { %v1319_v33 = vpop.eup %785  ;;  %803 = vpow2.f32 %v1245_v15  ;;  %v336_v5 = vmul.f32 1.442695, %v334_v9  ;;  %v203_v43 = vmax.f32 %v1108_v24, %v1053_v46  ;;  %v143_v29 = vadd.f32 %v141_v22, %v139_v41  ;;  %v1866_v54 = vld [vmem:[#allocation6_spill] sm:$0xff] }
  0x38   :  { %v159_v30 = vpack.c.bf16 %v157_v14, %v157_v14  ;;  %v1324_v19 = vpop.eup %787  ;;  %v1327_v21 = vmul.f32 %v1303_v44, %v676_v11  ;;  %805 = vpow2.f32 %v252_v51  ;;  %v251_v8 = vsub.f32 %v1134_v39, %v1149_v49 }
  0x39   :  { %v1331_v52 = vpop.eup %789  ;;  %807 = vpow2.f32 %v258_v27  ;;  %v205_v15 = vsub.f32 %v1108_v24, %v203_v43  ;;  %v211_v53 = vsub.f32 %v1053_v46, %v203_v43  ;;  %v257_v25 = vsub.f32 %v1043_v34, %v1149_v49 }
  0x3a   :  { %v163_v10 = vsel %vm1268_vm2, %v159_v30, %v679_v50  ;;  %809 = vpow2.f32 %v330_v4  ;;  %v254_v41 = vmul.f32 1.442695, %v251_v8  ;;  %v329_v39 = vsub.f32 %v1161_v62, %v1179_v35 }
  0x3b   :  { %680 = vst [vmem:[%s1814_s5 + $0x1] sm:$0x1] %v163_v10  ;;  %v792_v0 = vpop.eup %791  ;;  %811 = vpow2.f32 %v336_v5  ;;  %v208_v57 = vmul.f32 1.442695, %v205_v15  ;;  %v214_v55 = vmul.f32 1.442695, %v211_v53  ;;  %v335_v24 = vsub.f32 %v985_v12, %v1179_v35 }
  0x3c   :  { %v1346_v46 = vpop.eup %793  ;;  %v151_v28 = vmul.f32 %v792_v0, %v143_v29  ;;  %813 = vpow2.f32 %v254_v41  ;;  %v260_v7 = vmul.f32 1.442695, %v257_v25  ;;  %v332_v60 = vmul.f32 1.442695, %v329_v39  ;;  %v1867_v10 = vld [vmem:[#allocation14_spill] sm:$0xff] }
  0x3d   :  { %v1348_v61 = vpop.eup %795  ;;  %815 = vpow2.f32 %v208_v57  ;;  %v338_v34 = vmul.f32 1.442695, %v335_v24  ;;  %v406_v62 = vsub.f32 %v1145_v47, %v1157_v58  ;;  %v412_v31 = vsub.f32 %v1862_v20, %v1157_v58  ;;  %v681_v47 = vld [vmem:[%s1814_s5 + $0x9] sm:$0x1]  ;;  %v1869_v20 = vld [vmem:[#allocation19_spill] sm:$0xff] }
  0x3e   :  { %v1354_v11 = vpop.eup %797  ;;  %v1864_v12 = vunpack.c.l.bf16 %v1863_v23  ;;  %817 = vpow2.f32 %v214_v55  ;;  %v484_v9 = vsub.f32 %v1865_v59, %v1186_v16  ;;  %v490_v14 = vsub.f32 %v1866_v54, %v1186_v16  ;;  %v1880_v54 = vld [vmem:[#allocation8_spill] sm:$0xff] }
  0x3f   :  { %v1362_v27 = vpop.eup %799  ;;  %819 = vpow2.f32 %v260_v7  ;;  %v408_v50 = vmul.f32 1.442695, %v406_v62  ;;  %v414_v22 = vmul.f32 1.442695, %v412_v31  ;;  %v562_v4 = vsub.f32 %v1199_v6, %v1207_v40  ;;  %v1412_v62 = vld [vmem:[%s1813_s1 + $0x3] sm:$0x1] }
  0x40   :  { %v158_v51 = vmul.f32 %v1864_v12, %v151_v28  ;;  %v802_v30 = vpop.eup %801  ;;  %v185_v43 = vmul.f32 %v1225_v42, %v1237_v36  ;;  %821 = vpow2.f32 %v332_v60  ;;  %v486_v29 = vmul.f32 1.442695, %v484_v9  ;;  %v1385_v42 = vld [vmem:[%s1812_s2 + $0x2] sm:$0x1]  ;;  %1868 = vst [vmem:[#allocation5_spill] sm:$0xff] %v1412_v62 }
  0x41   :  { %v804_v8 = vpop.eup %803  ;;  %v1373_v15 = vmax.f32 %v1223_v32, %v1867_v10  ;;  %v222_v53 = vmul.f32 %v802_v30, %v1316_v45  ;;  %v1378_v41 = vadd.f32 %v1303_v44, %v1250_v2  ;;  %823 = vpow2.f32 %v338_v34  ;;  %v685_v2 = vld [vmem:[%s1813_s1 + $0x2] sm:$0x1] }
  0x42   :  { %v160_v5 = vpack.c.bf16 %v158_v51, %v158_v51  ;;  %v806_v6 = vpop.eup %805  ;;  %825 = vpow2.f32 %v408_v50  ;;  %v492_v36 = vmul.f32 1.442695, %v490_v14  ;;  %v568_v39 = vsub.f32 %v1010_v18, %v1207_v40  ;;  %v1870_v51 = vld [vmem:[#allocation11_spill] sm:$0xff] }
  0x43   :  { %v1389_v0 = vpop.eup %807  ;;  %v224_v44 = vadd.f32 %v804_v8, %v222_v53  ;;  %v262_v57 = vmul.f32 %v806_v6, %v1308_v17  ;;  %827 = vpow2.f32 %v414_v22  ;;  %v564_v55 = vmul.f32 1.442695, %v562_v4  ;;  %v686_v53 = vld [vmem:[%s1813_s1 + $0xa] sm:$0x1] }
  0x44   :  { %v166_v25 = vsel %vm1268_vm2, %v160_v5, %v681_v47  ;;  %v1398_v24 = vpop.eup %809  ;;  %v264_v28 = vmul.f32 %v1389_v0, %v685_v2  ;;  %v1402_v18 = vadd.f32 %v1327_v21, %v185_v43  ;;  %829 = vpow2.f32 %v486_v29 }
  0x45   :  { %682 = vst [vmem:[%s1814_s5 + $0x9] sm:$0x1] %v166_v25  ;;  %v570_v40 = vmul.f32 1.442695, %v568_v39  ;;  %v1404_v7 = vpop.eup %811  ;;  %831 = vrcp.f32 %v224_v44  ;;  %v233_v34 = vunpack.c.l.bf16 %v1385_v42  ;;  %v407_v31 = vsub.f32 %v1869_v20, %v1203_v38 }
  0x46   :  { %v814_v21 = vpop.eup %813  ;;  %v1416_v23 = vadd.f32 %v264_v28, %v262_v57  ;;  %v342_v12 = vmul.f32 %v1404_v7, %v1412_v62  ;;  %833 = vpow2.f32 %v492_v36  ;;  %v413_v59 = vsub.f32 %v1870_v51, %v1203_v38 }
  0x47   :  { %v816_v9 = vpop.eup %815  ;;  %v216_v14 = vmul.f32 %v802_v30, %v1308_v17  ;;  %835 = vpow2.f32 %v564_v55  ;;  %v410_v47 = vmul.f32 1.442695, %v407_v31  ;;  %v263_v5 = vmul.f32 %v814_v21, %v1402_v18  ;;  %v1871_v17 = vld [vmem:[#allocation20_spill] sm:$0xff]  ;;  %v1873_v55 = vld [vmem:[#allocation13_spill] sm:$0xff] }
  0x48   :  { %v818_v50 = vpop.eup %817  ;;  %v340_v22 = vmul.f32 %v1398_v24, %v1416_v23  ;;  %v223_v4 = vmul.f32 %v816_v9, %v1378_v41  ;;  %837 = vpow2.f32 %v570_v40  ;;  %v218_v29 = vmul.f32 %v804_v8, %v685_v2  ;;  %v1446_v2 = vld [vmem:[%s1813_s1 + $0xb] sm:$0x1] }
  0x49   :  { %v820_v43 = vpop.eup %819  ;;  %839 = vpow2.f32 %v410_v47  ;;  %v416_v25 = vmul.f32 1.442695, %v413_v59  ;;  %v485_v30 = vsub.f32 %v1871_v17, %v1223_v32  ;;  %v491_v28 = vsub.f32 %v1873_v55, %v1223_v32  ;;  %1874 = vst [vmem:[#allocation18_spill] sm:$0xff] %v1446_v2  ;;  %v688_v55 = vld [vmem:[%s1812_s2 + $0xa] sm:$0x1] }
  0x4a   :  { %v1434_v36 = vpop.eup %821  ;;  %v1436_v39 = vadd.f32 %v342_v12, %v340_v22  ;;  %v225_v44 = vadd.f32 %v818_v50, %v223_v4  ;;  %v265_v57 = vmul.f32 %v820_v43, %v686_v53  ;;  %v268_v8 = vmul.f32 %v806_v6, %v1316_v45  ;;  %v1457_v45 = vld [vmem:[%s1813_s1 + $0x4] sm:$0x1] }
  0x4b   :  { %v1440_v40 = vpop.eup %823  ;;  %841 = vpow2.f32 %v416_v25  ;;  %v488_v20 = vmul.f32 1.442695, %v485_v30  ;;  %v563_v31 = vsub.f32 %v1241_v56, %v1254_v63  ;;  %v494_v47 = vmul.f32 1.442695, %v491_v28  ;;  %1876 = vst [vmem:[#allocation14_spill] sm:$0xff] %v1457_v45  ;;  %v1877_v56 = vld [vmem:[#allocation12_spill] sm:$0xff] }
  0x4c   :  { %1872 = vst [vmem:[#allocation17_spill] sm:$0xff] %v1436_v39  ;;  %v826_v12 = vpop.eup %825  ;;  %843 = vrcp.f32 %v225_v44  ;;  %v1450_v51 = vadd.f32 %v265_v57, %v263_v5  ;;  %v343_v59 = vmul.f32 %v1440_v40, %v1446_v2  ;;  %v569_v25 = vsub.f32 %v1877_v56, %v1254_v63 }
  0x4d   :  { %v828_v22 = vpop.eup %827  ;;  %v418_v6 = vmul.f32 %v826_v12, %v1436_v39  ;;  %845 = vpow2.f32 %v488_v20  ;;  %v566_v4 = vmul.f32 1.442695, %v563_v31  ;;  %v220_v5 = vadd.f32 %v218_v29, %v216_v14 }
  0x4e   :  { %1875 = vst [vmem:[#allocation6_spill] sm:$0xff] %v1450_v51  ;;  %v1462_v17 = vpop.eup %829  ;;  %v341_v30 = vmul.f32 %v1434_v36, %v1450_v51  ;;  %v420_v44 = vmul.f32 %v828_v22, %v1457_v45  ;;  %847 = vpow2.f32 %v494_v47  ;;  %v269_v28 = vmul.f32 %v814_v21, %v1378_v41  ;;  %v1483_v47 = vld [vmem:[%s1813_s1 + $0x5] sm:$0x1] }
  0x4f   :  { %v832_v57 = vpop.eup %831  ;;  %849 = vpow2.f32 %v566_v4  ;;  %v572_v20 = vmul.f32 1.442695, %v569_v25  ;;  %v1472_v63 = vadd.f32 %v1389_v0, %v268_v8  ;;  %1879 = vst [vmem:[#allocation11_spill] sm:$0xff] %v1483_v47  ;;  %v1487_v41 = vmax.f32 %v1157_v58, %v1880_v54 }
  0x50   :  { %v1474_v31 = vpop.eup %833  ;;  %v228_v14 = vmul.f32 %v832_v57, %v220_v5  ;;  %v1476_v29 = vadd.f32 %v343_v59, %v341_v30  ;;  %v1478_v56 = vadd.f32 %v420_v44, %v418_v6  ;;  %v217_v0 = vmul.f32 %v816_v9, %v1402_v18  ;;  %v689_v9 = vld [vmem:[%s1814_s5 + $0x2] sm:$0x1] }
  0x51   :  { %v1489_v21 = vpop.eup %835  ;;  %v498_v8 = vmul.f32 %v1474_v31, %v1483_v47  ;;  %851 = vpow2.f32 %v572_v20  ;;  %v346_v59 = vmul.f32 %v1398_v24, %v1472_v63  ;;  %v234_v25 = vunpack.c.l.bf16 %v688_v55  ;;  %v1510_v24 = vld [vmem:[%s1813_s1 + $0x6] sm:$0x1] }
  0x52   :  { %1878 = vst [vmem:[#allocation19_spill] sm:$0xff] %v1476_v29  ;;  %v1496_v6 = vpop.eup %837  ;;  %v235_v4 = vmul.f32 %v233_v34, %v228_v14  ;;  %v496_v5 = vmul.f32 %v1462_v17, %v1478_v56  ;;  %v438_v30 = vsub.f32 %v1157_v58, %v1487_v41  ;;  %v219_v44 = vmul.f32 %v818_v50, %v686_v53 }
  0x53   :  { %v840_v18 = vpop.eup %839  ;;  %v1513_v42 = vadd.f32 %v1404_v7, %v346_v59  ;;  %v516_v34 = vsub.f32 %v1186_v16, %v1229_v48  ;;  %v1517_v57 = vadd.f32 %v820_v43, %v269_v28  ;;  %v576_v20 = vmul.f32 %v1496_v6, %v1510_v24  ;;  %v1527_v7 = vld [vmem:[%s1813_s1 + $0x7] sm:$0x1]  ;;  %v1532_v16 = vld [vmem:[%s1813_s1 + $0xc] sm:$0x1] }
  0x54   :  { %v237_v58 = vpack.c.bf16 %v235_v4, %v235_v4  ;;  %v1519_v55 = vadd.f32 %v498_v8, %v496_v5  ;;  %v419_v50 = vmul.f32 %v840_v18, %v1476_v29  ;;  %v221_v14 = vadd.f32 %v219_v44, %v217_v0  ;;  %1881 = vst [vmem:[#allocation20_spill] sm:$0xff] %v1532_v16  ;;  %v1882_v8 = vld [vmem:[#allocation16_spill] sm:$0xff] }
  0x55   :  { %v842_v53 = vpop.eup %841  ;;  %v424_v43 = vmul.f32 %v826_v12, %v1513_v42  ;;  %v347_v28 = vmul.f32 %v1434_v36, %v1517_v57  ;;  %v1539_v59 = vmax.f32 %v1203_v38, %v1882_v8  ;;  %v654_v44 = vmul.f32 %v1331_v52, %v1527_v7 }
  0x56   :  { %v844_v0 = vpop.eup %843  ;;  %v241_v4 = vsel %vm1268_vm2, %v237_v58, %v689_v9  ;;  %v574_v5 = vmul.f32 %v1489_v21, %v1519_v55  ;;  %v421_v60 = vmul.f32 %v842_v53, %v1532_v16  ;;  %v518_v45 = vmul.f32 1.442695, %v516_v34  ;;  %v1563_v16 = vld [vmem:[%s1813_s1 + $0xd] sm:$0x1] }
  0x57   :  { %v846_v12 = vpop.eup %845  ;;  %690 = vst [vmem:[%s1814_s5 + $0x2] sm:$0x1] %v241_v4  ;;  %v229_v36 = vmul.f32 %v844_v0, %v221_v14  ;;  %v1551_v29 = vadd.f32 %v828_v22, %v424_v43  ;;  %v1554_v39 = vadd.f32 %v1440_v40, %v347_v28  ;;  %1884 = vst [vmem:[#allocation12_spill] sm:$0xff] %v1563_v16  ;;  %v440_v28 = vmul.f32 1.442695, %v438_v30 }
  0x58   :  { %v848_v9 = vpop.eup %847  ;;  %v1556_v58 = vadd.f32 %v576_v20, %v574_v5  ;;  %v1558_v2 = vadd.f32 %v421_v60, %v419_v50  ;;  %v439_v4 = vsub.f32 %v1203_v38, %v1539_v59  ;;  %v517_v22 = vsub.f32 %v1223_v32, %v1373_v15  ;;  %v1573_v60 = vld [vmem:[%s1813_s1 + $0xf] sm:$0x1]  ;;  %v691_v38 = vld [vmem:[%s1814_s5 + $0xa] sm:$0x1] }
  0x59   :  { %1883 = vst [vmem:[#allocation13_spill] sm:$0xff] %v1554_v39  ;;  %v850_v34 = vpop.eup %849  ;;  %v236_v14 = vmul.f32 %v234_v25, %v229_v36  ;;  %v499_v40 = vmul.f32 %v848_v9, %v1563_v16  ;;  %v502_v20 = vmul.f32 %v1462_v17, %v1551_v29  ;;  %v425_v50 = vmul.f32 %v840_v18, %v1554_v39  ;;  %v1589_v17 = vld [vmem:[%s1813_s1 + $0xe] sm:$0x1] }
  0x5a   :  { %v652_v32 = vmul.f32 %v1324_v19, %v1556_v58  ;;  %v497_v25 = vmul.f32 %v846_v12, %v1558_v2  ;;  %v655_v43 = vmul.f32 %v1362_v27, %v1573_v60  ;;  %v1885_v36 = vsub.f32 %v1029_v26, %v1229_v48 }
  0x5b   :  { %v852_v0 = vpop.eup %851  ;;  %v238_v5 = vpack.c.bf16 %v236_v14, %v236_v14  ;;  %v1592_v18 = vadd.f32 %v1474_v31, %v502_v20  ;;  %v1597_v39 = vadd.f32 %v842_v53, %v425_v50  ;;  %853 = vpow2.f32 %v518_v45  ;;  %v1886_v45 = vld [vmem:[#allocation7_spill] sm:$0xff] }
  0x5c   :  { %v524_v16 = vmul.f32 1.442695, %v1885_v36  ;;  %v656_v51 = vadd.f32 %v654_v44, %v652_v32  ;;  %v1599_v47 = vadd.f32 %v499_v40, %v497_v25  ;;  %v577_v30 = vmul.f32 %v852_v0, %v1589_v17  ;;  %v1887_v40 = vld [vmem:[#allocation10_spill] sm:$0xff] }
  0x5d   :  { %v244_v14 = vsel %vm1268_vm2, %v238_v5, %v691_v38  ;;  %v580_v62 = vmul.f32 %v1489_v21, %v1592_v18  ;;  %v503_v31 = vmul.f32 %v846_v12, %v1597_v39  ;;  %v520_v20 = vmul.f32 1.442695, %v517_v22 }
  0x5e   :  { %692 = vst [vmem:[%s1814_s5 + $0xa] sm:$0x1] %v244_v14  ;;  %663 = vst.msk [vmem:[#allocation2] sm:$0x1] %vm24_vm0, %v656_v51  ;;  %v575_v26 = vmul.f32 %v850_v34, %v1599_v47  ;;  %855 = vpow2.f32 %v440_v28  ;;  %v442_v48 = vmul.f32 1.442695, %v439_v4  ;;  %v280_v53 = vmax.f32 %v1082_v3, %v1886_v45 }
  0x5f   :  { %857 = vpow2.f32 %v524_v16  ;;  %v582_v44 = vadd.f32 %v1496_v6, %v580_v62  ;;  %v505_v21 = vadd.f32 %v848_v9, %v503_v31  ;;  %v281_v12 = vmax.f32 %v1149_v49, %v1887_v40 }
  0x60   :  { %v1617_v22 = vadd.f32 %v577_v30, %v575_v26  ;;  %v1888_v50 = vsub.f32 %v1867_v10, %v1373_v15  ;;  %v282_v38 = vsub.f32 %v1082_v3, %v280_v53  ;;  %v288_v4 = vsub.f32 %v1886_v45, %v280_v53 }
  0x61   :  { %v612_v32 = vmul.f32 %v1310_v1, %v582_v44  ;;  %v658_v16 = vmul.f32 %v1324_v19, %v582_v44  ;;  %859 = vpow2.f32 %v520_v20  ;;  %v581_v62 = vmul.f32 %v850_v34, %v505_v21  ;;  %v1889_v19 = vld [vmem:[#allocation9_spill] sm:$0xff]  ;;  %v1890_v44 = vld [vmem:[#allocation15_spill] sm:$0xff] }
  0x62   :  { %v526_v51 = vmul.f32 1.442695, %v1888_v50  ;;  %v653_v6 = vmul.f32 %v1354_v11, %v1617_v22  ;;  %861 = vpow2.f32 %v442_v48  ;;  %v284_v9 = vmul.f32 1.442695, %v282_v38 }
  0x63   :  { %v290_v25 = vmul.f32 1.442695, %v288_v4  ;;  %v614_v28 = vadd.f32 %v1319_v33, %v612_v32  ;;  %v660_v10 = vadd.f32 %v1331_v52, %v658_v16  ;;  %v583_v15 = vadd.f32 %v852_v0, %v581_v62 }
  0x64   :  { %v283_v3 = vsub.f32 %v1149_v49, %v281_v12  ;;  %v657_v5 = vadd.f32 %v655_v43, %v653_v6  ;;  %863 = vpow2.f32 %v284_v9  ;;  %v289_v36 = vsub.f32 %v1887_v40, %v281_v12 }
  0x65   :  { %v358_v34 = vmax.f32 %v1129_v37, %v1889_v19  ;;  %665 = vst.msk [vmem:[#allocation3] sm:$0x1] %vm24_vm0, %v660_v10  ;;  %865 = vpow2.f32 %v526_v51  ;;  %v613_v30 = vmul.f32 %v1346_v46, %v583_v15  ;;  %v659_v14 = vmul.f32 %v1354_v11, %v583_v15  ;;  %v1637_v20 = vpop.eup %853 }
  0x66   :  { %v286_v31 = vmul.f32 1.442695, %v283_v3  ;;  %664 = vst.msk [vmem:[#allocation2 + $0x1] sm:$0x1] %vm24_vm0, %v657_v5  ;;  %867 = vpow2.f32 %v290_v25  ;;  %v292_v49 = vmul.f32 1.442695, %v289_v36  ;;  %v359_v40 = vmax.f32 %v1179_v35, %v1890_v44 }
  0x67   :  { %v360_v52 = vsub.f32 %v1129_v37, %v358_v34  ;;  %v366_v43 = vsub.f32 %v1889_v19, %v358_v34  ;;  %v615_v0 = vadd.f32 %v1348_v61, %v613_v30  ;;  %v661_v26 = vadd.f32 %v1362_v27, %v659_v14  ;;  %v737_v3 = vld [vmem:[%s1812_s2 + $0x7] sm:$0x1]  ;;  %v1684_v34 = vld [vmem:[%s1812_s2 + $0x6] sm:$0x1] }
  0x68   :  { %869 = vpow2.f32 %v286_v31  ;;  %v856_v48 = vpop.eup %855  ;;  %v534_v37 = vmul.f32 %v1637_v20, %v1592_v18  ;;  %v444_v12 = vsub.f32 %v1880_v54, %v1487_v41  ;;  %v361_v50 = vsub.f32 %v1179_v35, %v359_v40  ;;  %v1658_v54 = vld [vmem:[%s1812_s2 + $0x3] sm:$0x1]  ;;  %v1663_v35 = vld [vmem:[%s1812_s2 + $0xb] sm:$0x1] }
  0x69   :  { %871 = vrcp.f32 %v614_v28  ;;  %v362_v45 = vmul.f32 1.442695, %v360_v52  ;;  %v368_v11 = vmul.f32 1.442695, %v366_v43  ;;  %v858_v53 = vpop.eup %857  ;;  %666 = vst.msk [vmem:[#allocation3 + $0x1] sm:$0x1] %vm24_vm0, %v661_v26  ;;  %v367_v51 = vsub.f32 %v1890_v44, %v359_v40 }
  0x6a   :  { %873 = vpow2.f32 %v292_v49  ;;  %v446_v32 = vmul.f32 1.442695, %v444_v12  ;;  %v445_v16 = vsub.f32 %v1882_v8, %v1539_v59  ;;  %v364_v62 = vmul.f32 1.442695, %v361_v50  ;;  %v739_v12 = vld [vmem:[%s1814_s5 + $0x7] sm:$0x1] }
  0x6b   :  { %875 = vpow2.f32 %v362_v45  ;;  %v860_v27 = vpop.eup %859  ;;  %v370_v6 = vmul.f32 1.442695, %v367_v51  ;;  %v536_v9 = vadd.f32 %v858_v53, %v534_v37  ;;  %v608_v8 = vmul.f32 %v1319_v33, %v1527_v7  ;;  %v1892_v51 = vld [vmem:[#allocation11_spill] sm:$0xff] }
  0x6c   :  { %877 = vrcp.f32 %v615_v0  ;;  %v862_v38 = vpop.eup %861  ;;  %v535_v4 = vmul.f32 %v860_v27, %v505_v21  ;;  %v448_v41 = vmul.f32 1.442695, %v445_v16  ;;  %v609_v28 = vmul.f32 %v1348_v61, %v1573_v60 }
  0x6d   :  { %879 = vpow2.f32 %v368_v11  ;;  %v606_v15 = vmul.f32 %v1310_v1, %v1556_v58  ;;  %v311_v33 = vunpack.c.l.bf16 %v1658_v54  ;;  %v456_v19 = vmul.f32 %v856_v48, %v1551_v29  ;;  %v738_v29 = vld [vmem:[%s1812_s2 + $0xf] sm:$0x1] }
  0x6e   :  { %v864_v18 = vpop.eup %863  ;;  %881 = vpow2.f32 %v446_v32  ;;  %v457_v61 = vmul.f32 %v862_v38, %v1597_v39  ;;  %v450_v58 = vmul.f32 %v856_v48, %v1478_v56  ;;  %v623_v14 = vunpack.c.l.bf16 %v737_v3  ;;  %v1893_v32 = vld [vmem:[#allocation6_spill] sm:$0xff] }
  0x6f   :  { %v866_v21 = vpop.eup %865  ;;  %v300_v59 = vmul.f32 %v864_v18, %v1472_v63  ;;  %883 = vpow2.f32 %v364_v62  ;;  %v312_v63 = vunpack.c.l.bf16 %v1663_v35  ;;  %v610_v30 = vadd.f32 %v608_v8, %v606_v15  ;;  %v1894_v62 = vld [vmem:[#allocation13_spill] sm:$0xff] }
  0x70   :  { %v868_v25 = vpop.eup %867  ;;  %v537_v10 = vadd.f32 %v866_v21, %v535_v4  ;;  %885 = vpow2.f32 %v370_v6  ;;  %v607_v56 = vmul.f32 %v1346_v46, %v1617_v22  ;;  %v451_v43 = vmul.f32 %v862_v38, %v1558_v2  ;;  %v728_v46 = vld [vmem:[%s1812_s2 + $0xe] sm:$0x1]  ;;  %v1891_v22 = vld [vmem:[#allocation5_spill] sm:$0xff] }
  0x71   :  { %v302_v36 = vadd.f32 %v868_v25, %v300_v59  ;;  %887 = vpow2.f32 %v448_v41  ;;  %v530_v0 = vmul.f32 %v858_v53, %v1510_v24  ;;  %v545_v45 = vunpack.c.l.bf16 %v1684_v34  ;;  %v741_v59 = vld [vmem:[%s1814_s5 + $0xf] sm:$0x1] }
  0x72   :  { %v870_v5 = vpop.eup %869  ;;  %889 = vrcp.f32 %v536_v9  ;;  %v611_v11 = vadd.f32 %v609_v28, %v607_v56  ;;  %v624_v44 = vunpack.c.l.bf16 %v738_v29  ;;  %v529_v40 = vmul.f32 %v860_v27, %v1599_v47  ;;  %v707_v56 = vld [vmem:[%s1812_s2 + $0x4] sm:$0x1] }
  0x73   :  { %v872_v7 = vpop.eup %871  ;;  %v301_v60 = vmul.f32 %v870_v5, %v1517_v57  ;;  %891 = vrcp.f32 %v302_v36  ;;  %v528_v57 = vmul.f32 %v1637_v20, %v1519_v55  ;;  %v294_v55 = vmul.f32 %v864_v18, %v1416_v23 }
  0x74   :  { %v874_v1 = vpop.eup %873  ;;  %893 = vrcp.f32 %v537_v10  ;;  %v618_v26 = vmul.f32 %v872_v7, %v610_v30  ;;  %v296_v24 = vmul.f32 %v868_v25, %v1891_v22  ;;  %v531_v37 = vmul.f32 %v866_v21, %v1589_v17  ;;  %v1895_v10 = vld [vmem:[#allocation12_spill] sm:$0xff]  ;;  %v1896_v7 = vld [vmem:[#allocation18_spill] sm:$0xff] }
  0x75   :  { %v876_v31 = vpop.eup %875  ;;  %v303_v39 = vadd.f32 %v874_v1, %v301_v60  ;;  %v532_v53 = vadd.f32 %v530_v0, %v528_v57  ;;  %v295_v16 = vmul.f32 %v870_v5, %v1893_v32  ;;  %v546_v18 = vunpack.c.l.bf16 %v728_v46  ;;  %v1897_v60 = vld [vmem:[#allocation17_spill] sm:$0xff] }
  0x76   :  { %v878_v49 = vpop.eup %877  ;;  %v378_v52 = vmul.f32 %v876_v31, %v1513_v42  ;;  %v625_v42 = vmul.f32 %v623_v14, %v618_v26  ;;  %v298_v17 = vadd.f32 %v296_v24, %v294_v55  ;;  %v533_v30 = vadd.f32 %v531_v37, %v529_v40  ;;  %v729_v26 = vld [vmem:[%s1814_s5 + $0x6] sm:$0x1] }
  0x77   :  { %v880_v48 = vpop.eup %879  ;;  %895 = vrcp.f32 %v303_v39  ;;  %v619_v50 = vmul.f32 %v878_v49, %v611_v11  ;;  %v699_v11 = vld [vmem:[%s1814_s5 + $0x3] sm:$0x1] }
  0x78   :  { %v380_v20 = vadd.f32 %v880_v48, %v378_v52  ;;  %v882_v2 = vpop.eup %881  ;;  %v627_v38 = vpack.c.bf16 %v625_v42, %v625_v42 }
  0x79   :  { %v884_v23 = vpop.eup %883  ;;  %v452_v47 = vmul.f32 %v882_v2, %v1892_v51  ;;  %v458_v27 = vadd.f32 %v882_v2, %v456_v19  ;;  %v626_v9 = vmul.f32 %v624_v44, %v619_v50  ;;  %v297_v19 = vmul.f32 %v874_v1, %v1896_v7  ;;  %v717_v44 = vld [vmem:[%s1812_s2 + $0x5] sm:$0x1]  ;;  %v1899_v2 = vld [vmem:[#allocation19_spill] sm:$0xff]  ;;  %v708_v51 = vld [vmem:[%s1812_s2 + $0xc] sm:$0x1] }
  0x7a   :  { %897 = vrcp.f32 %v380_v20  ;;  %v886_v4 = vpop.eup %885  ;;  %v379_v6 = vmul.f32 %v884_v23, %v1894_v62  ;;  %v631_v8 = vsel %vm1268_vm2, %v627_v38, %v739_v12  ;;  %v373_v22 = vmul.f32 %v884_v23, %v1899_v2  ;;  %v701_v12 = vld [vmem:[%s1814_s5 + $0xb] sm:$0x1]  ;;  %v718_v38 = vld [vmem:[%s1812_s2 + $0xd] sm:$0x1] }
  0x7b   :  { %v888_v41 = vpop.eup %887  ;;  %v454_v21 = vadd.f32 %v452_v47, %v450_v58  ;;  %899 = vrcp.f32 %v458_v27  ;;  %740 = vst [vmem:[%s1814_s5 + $0x7] sm:$0x1] %v631_v8  ;;  %v628_v5 = vpack.c.bf16 %v626_v9, %v626_v9  ;;  %v372_v58 = vmul.f32 %v876_v31, %v1897_v60  ;;  %v1900_v47 = vld [vmem:[#allocation20_spill] sm:$0xff] }
  0x7c   :  { %v890_v25 = vpop.eup %889  ;;  %v381_v28 = vadd.f32 %v886_v4, %v379_v6  ;;  %v453_v15 = vmul.f32 %v888_v41, %v1895_v10  ;;  %v459_v3 = vadd.f32 %v888_v41, %v457_v61  ;;  %v299_v61 = vadd.f32 %v297_v19, %v295_v16 }
  0x7d   :  { %v892_v36 = vpop.eup %891  ;;  %v540_v34 = vmul.f32 %v890_v25, %v532_v53  ;;  %v634_v57 = vsel %vm1268_vm2, %v628_v5, %v741_v59  ;;  %v467_v35 = vunpack.c.l.bf16 %v717_v44  ;;  %v375_v27 = vmul.f32 %v886_v4, %v1900_v47  ;;  %v709_v4 = vld [vmem:[%s1814_s5 + $0x4] sm:$0x1] }
  0x7e   :  { %v894_v14 = vpop.eup %893  ;;  %v306_v29 = vmul.f32 %v892_v36, %v298_v17  ;;  %901 = vrcp.f32 %v381_v28  ;;  %v455_v39 = vadd.f32 %v453_v15, %v451_v43  ;;  %742 = vst [vmem:[%s1814_s5 + $0xf] sm:$0x1] %v634_v57  ;;  %v1898_v43 = vld [vmem:[#allocation14_spill] sm:$0xff]  ;;  %v390_v9 = vunpack.c.l.bf16 %v708_v51  ;;  %v719_v28 = vld [vmem:[%s1814_s5 + $0x5] sm:$0x1] }
  0x7f   :  { %903 = vrcp.f32 %v459_v3  ;;  %v547_v49 = vmul.f32 %v545_v45, %v540_v34  ;;  %v541_v52 = vmul.f32 %v894_v14, %v533_v30  ;;  %v374_v0 = vmul.f32 %v880_v48, %v1898_v43  ;;  %v731_v48 = vld [vmem:[%s1814_s5 + $0xe] sm:$0x1]  ;;  %v711_v36 = vld [vmem:[%s1814_s5 + $0xc] sm:$0x1] }
  0x80   :  { %v313_v31 = vmul.f32 %v311_v33, %v306_v29  ;;  %v389_v33 = vunpack.c.l.bf16 %v707_v56  ;;  %v468_v8 = vunpack.c.l.bf16 %v718_v38 }
  0x81   :  { %v896_v1 = vpop.eup %895  ;;  %v549_v55 = vpack.c.bf16 %v547_v49, %v547_v49  ;;  %v548_v20 = vmul.f32 %v546_v18, %v541_v52  ;;  %v376_v54 = vadd.f32 %v374_v0, %v372_v58  ;;  %v377_v18 = vadd.f32 %v375_v27, %v373_v22  ;;  %v721_v58 = vld [vmem:[%s1814_s5 + $0xd] sm:$0x1] }
  0x82   :  { %v307_v45 = vmul.f32 %v896_v1, %v299_v61  ;;  %v315_v40 = vpack.c.bf16 %v313_v31, %v313_v31 }
  0x83   :  { %v553_v24 = vsel %vm1268_vm2, %v549_v55, %v729_v26  ;;  %v550_v53 = vpack.c.bf16 %v548_v20, %v548_v20 }
  0x84   :  { %v898_v46 = vpop.eup %897  ;;  %v314_v42 = vmul.f32 %v312_v63, %v307_v45  ;;  %v319_v37 = vsel %vm1268_vm2, %v315_v40, %v699_v11  ;;  %730 = vst [vmem:[%s1814_s5 + $0x6] sm:$0x1] %v553_v24 }
  0x85   :  { %v384_v50 = vmul.f32 %v898_v46, %v376_v54  ;;  %v900_v63 = vpop.eup %899  ;;  %700 = vst [vmem:[%s1814_s5 + $0x3] sm:$0x1] %v319_v37  ;;  %v556_v32 = vsel %vm1268_vm2, %v550_v53, %v731_v48 }
  0x86   :  { %v316_v23 = vpack.c.bf16 %v314_v42, %v314_v42  ;;  %v462_v62 = vmul.f32 %v900_v63, %v454_v21  ;;  %732 = vst [vmem:[%s1814_s5 + $0xe] sm:$0x1] %v556_v32 }
  0x87   :  { %v391_v16 = vmul.f32 %v389_v33, %v384_v50 }
  0x88   :  { %v322_v6 = vsel %vm1268_vm2, %v316_v23, %v701_v12  ;;  %v902_v41 = vpop.eup %901  ;;  %v469_v21 = vmul.f32 %v467_v35, %v462_v62 }
  0x89   :  { %702 = vst [vmem:[%s1814_s5 + $0xb] sm:$0x1] %v322_v6  ;;  %v393_v17 = vpack.c.bf16 %v391_v16, %v391_v16  ;;  %v904_v59 = vpop.eup %903  ;;  %v385_v25 = vmul.f32 %v902_v41, %v377_v18 }
  0x8a   :  { %v471_v15 = vpack.c.bf16 %v469_v21, %v469_v21  ;;  %v463_v3 = vmul.f32 %v904_v59, %v455_v39 }
  0x8b   :  { %v397_v10 = vsel %vm1268_vm2, %v393_v17, %v709_v4  ;;  %v392_v5 = vmul.f32 %v390_v9, %v385_v25 }
  0x8c   :  { %710 = vst [vmem:[%s1814_s5 + $0x4] sm:$0x1] %v397_v10  ;;  %v475_v7 = vsel %vm1268_vm2, %v471_v15, %v719_v28  ;;  %v470_v19 = vmul.f32 %v468_v8, %v463_v3 }
  0x8d   :  { %v394_v60 = vpack.c.bf16 %v392_v5, %v392_v5  ;;  %720 = vst [vmem:[%s1814_s5 + $0x5] sm:$0x1] %v475_v7 }
  0x8e   :  { %v472_v34 = vpack.c.bf16 %v470_v19, %v470_v19 }
  0x8f   :  { %v400_v30 = vsel %vm1268_vm2, %v394_v60, %v711_v36 }
  0x90   :  { %712 = vst [vmem:[%s1814_s5 + $0xc] sm:$0x1] %v400_v30  ;;  %v478_v14 = vsel %vm1268_vm2, %v472_v34, %v721_v58 }
  0x91   :  { %722 = vst [vmem:[%s1814_s5 + $0xd] sm:$0x1] %v478_v14 }

</bundles_post_ra>
